<compile_context>
chip_gen: v7x
topology: tpu7x:2x2x1
jax: 0.10.0
libtpu: 0.0.40
codegen_flags: <defaults>
</compile_context>

<pallas_src>
import functools
import math

import jax
import jax.numpy as jnp
from jax.experimental import pallas as pl
from jax.experimental.pallas import tpu as pltpu

ACT_DTYPE = jnp.bfloat16       # inter-kernel activation stream
MATMUL_DTYPE = jnp.bfloat16    # MXU operand dtype (f32 accumulation everywhere)
EPS = 1e-5                     # nn.LayerNorm default
SOFTMAX_APPROX_RECIPROCAL = True  # EUP vrcp for the softmax denominator (switchable)

# Minimum number of sequences (B*T) required to use the fused all-layers call.
# With the default double-buffered pipeline (1-step prefetch lookahead) and at
# most 2 TensorCores sharding the 'parallel' N axis, >=4 sequences per core
# guarantee that the in-place (aliased) writeback of layer l's block n has been
# waited on before layer l+1 prefetches that same block.
MERGED_MIN_SEQS = 8


@functools.lru_cache(maxsize=1)
def _vmem_limit_bytes():
    """~75% of per-core VMEM: ~48 MiB on v7x (64 MiB), ~96 MiB on v5e/v6e (128 MiB)."""
    cap = None
    try:
        cap = getattr(pltpu.get_tpu_info(), "vmem_capacity_bytes", None)
    except Exception:
        cap = None
    if not cap:
        cap = 64 * 1024 * 1024          # conservative fallback, safe on every gen
    return int(cap) * 3 // 4


def _layernorm(x, g, b):
    mu = jnp.mean(x, axis=-1, keepdims=True)
    xc = x - mu
    var = jnp.mean(xc * xc, axis=-1, keepdims=True)
    return xc * jax.lax.rsqrt(var + EPS) * g + b


# ---------------------------------------------------------------------------
# Kernel 1: fused patch embedding (conv1 as matmul) + class token + positional
#           embedding + ln_pre.  grid over N; conv weight resident (constant
#           index_map); one layernorm over the full (L, D) tile and a single
#           aligned full-tile store (no sublane-offset partial stores).
# ---------------------------------------------------------------------------
def _embed_kernel(patch_ref, wconv_ref, cls_ref, pos_ref, g_ref, b_ref, o_ref):
    pe = jnp.dot(patch_ref[0], wconv_ref[...],
                 preferred_element_type=jnp.float32)            # (hw, D) f32
    full = jnp.concatenate([cls_ref[...], pe], axis=0) + pos_ref[...]   # (L, D)
    o_ref[0] = _layernorm(full, g_ref[...], b_ref[...]).astype(o_ref.dtype)


# ---------------------------------------------------------------------------
# Kernel 2: one fused ResidualAttentionBlock (ln1 -> MHA -> res, ln2 -> MLP -> res)
#           Used either with grid=(layers, N) (stacked weights, layer axis
#           'arbitrary', in-place activations) or per-layer with grid=(N,).
#           bf16 MXU operands, f32 accumulation.  1/sqrt(dh) is pre-folded into
#           the q slice of wqkv/bqkv.  Single K transpose per sequence; heads
#           are processed in groups whose output width is a multiple of 128
#           lanes so the attention-slab stores are lane-dense.
# ---------------------------------------------------------------------------
def _make_resblock_kernel(num_heads, head_dim):
    D = num_heads * head_dim
    if head_dim >= 128:
        hpg = 1
    else:
        hpg = max(1, 128 // head_dim)
        while num_heads % hpg:
            hpg -= 1
    n_groups = num_heads // hpg
    gw = hpg * head_dim                      # group store width (128 when dh=64)

    def kernel(x_ref, ln1g, ln1b, wqkv, bqkv, wo, bo,
               ln2g, ln2b, wfc, bfc, wpr, bpr, o_ref, attn_scr):
        x = x_ref[0].astype(jnp.float32)                                # (L, D)

        # --- multi-head self attention ---
        h = _layernorm(x, ln1g[0], ln1b[0])
        qkv_f32 = jnp.dot(h.astype(MATMUL_DTYPE), wqkv[0],
                          preferred_element_type=jnp.float32) + bqkv[0]  # (L, 3D)
        # one XLU transpose of the whole K block instead of one per head
        kT = qkv_f32[:, D:2 * D].T.astype(MATMUL_DTYPE)                  # (D, L)
        qkv = qkv_f32.astype(MATMUL_DTYPE)                               # bf16 slab

        for g in range(n_groups):                                        # static unroll
            outs = []
            for i in range(hpg):
                lo = (g * hpg + i) * head_dim
                qh = qkv[:, lo:lo + head_dim]                            # scale folded in
                vh = qkv[:, 2 * D + lo:2 * D + lo + head_dim]
                khT = kT[lo:lo + head_dim, :]                            # sublane slice
                s = jnp.dot(qh, khT, preferred_element_type=jnp.float32)  # (L, L)
                s = s - jnp.max(s, axis=-1, keepdims=True)
                p = jnp.exp(s)
                denom = jnp.sum(p, axis=-1, keepdims=True)
                if SOFTMAX_APPROX_RECIPROCAL:
                    p = p * pl.reciprocal(denom, approx=True)            # EUP slot
                else:
                    p = p / denom
                outs.append(jnp.dot(p.astype(MATMUL_DTYPE), vh,
                                    preferred_element_type=jnp.float32))
            blk = outs[0] if hpg == 1 else jnp.concatenate(outs, axis=-1)
            glo = g * gw
            attn_scr[:, glo:glo + gw] = blk.astype(attn_scr.dtype)       # lane-dense store

        attn = jnp.dot(attn_scr[...], wo[0],
                       preferred_element_type=jnp.float32) + bo[0]
        x = x + attn

        # --- MLP with QuickGELU (OpenAI CLIP) ---
        h2 = _layernorm(x, ln2g[0], ln2b[0])
        f = jnp.dot(h2.astype(MATMUL_DTYPE), wfc[0],
                    preferred_element_type=jnp.float32) + bfc[0]
        f = f * jax.nn.sigmoid(1.702 * f)                                # QuickGELU (f32)
        f = jnp.dot(f.astype(MATMUL_DTYPE), wpr[0],
                    preferred_element_type=jnp.float32) + bpr[0]
        o_ref[0] = (x + f).astype(o_ref.dtype)

    return kernel


# ---------------------------------------------------------------------------
# Kernel 3: cls head: ln_post(cls tokens) @ proj, mean over T — fully vectorized
#           (no per-row Python loop), single (B, E) store.
# ---------------------------------------------------------------------------
def _cls_head_kernel(cls_ref, g_ref, b_ref, proj_ref, o_ref):
    Bv, E = o_ref.shape
    T = cls_ref.shape[0] // Bv
    y = _layernorm(cls_ref[...].astype(jnp.float32), g_ref[...], b_ref[...])  # (B*T, D)
    y = jnp.dot(y.astype(MATMUL_DTYPE), proj_ref[...],
                preferred_element_type=jnp.float32)                           # (B*T, E)
    o_ref[...] = jnp.mean(y.reshape(Bv, T, E), axis=1).astype(o_ref.dtype)


# ---------------------------------------------------------------------------
# Parameter init (deterministic, mirrors the PyTorch module's parameter shapes)
# ---------------------------------------------------------------------------
def init_params(key, *, width, patch, in_chans, grid, layers, out_dim):
    D = width
    L = grid[0] * grid[1] + 1
    keys = jax.random.split(key, 4 + layers)

    def nrm(k, shape, scale=0.02):
        return scale * jax.random.normal(k, shape, dtype=jnp.float32)

    params = {
        "conv1_w": nrm(keys[0], (D, in_chans, patch, patch)),   # Conv2d(3, D, P, P, bias=False)
        "class_embedding": nrm(keys[1], (1, D)),                # (D,) in torch, kept 2D here
        "positional_embedding": nrm(keys[2], (L, D)),
        "ln_pre_g": jnp.ones((1, D), jnp.float32),
        "ln_pre_b": jnp.zeros((1, D), jnp.float32),
        "ln_post_g": jnp.ones((1, D), jnp.float32),
        "ln_post_b": jnp.zeros((1, D), jnp.float32),
        "proj": nrm(keys[3], (D, out_dim)),
        "blocks": [],
    }
    for l in range(layers):
        bk = jax.random.split(keys[4 + l], 4)
        params["blocks"].append({
            "ln1_g": jnp.ones((1, D), jnp.float32),
            "ln1_b": jnp.zeros((1, D), jnp.float32),
            "wqkv": nrm(bk[0], (3 * D, D)),      # nn.MultiheadAttention.in_proj_weight
            "bqkv": jnp.zeros((1, 3 * D), jnp.float32),
            "wo": nrm(bk[1], (D, D)),            # out_proj.weight
            "bo": jnp.zeros((1, D), jnp.float32),
            "ln2_g": jnp.ones((1, D), jnp.float32),
            "ln2_b": jnp.zeros((1, D), jnp.float32),
            "wfc": nrm(bk[2], (4 * D, D)),       # mlp.c_fc.weight
            "bfc": jnp.zeros((1, 4 * D), jnp.float32),
            "wpr": nrm(bk[3], (D, 4 * D)),       # mlp.c_proj.weight
            "bpr": jnp.zeros((1, D), jnp.float32),
        })
    return params


# ---------------------------------------------------------------------------
# One-time weight preparation: transpose to matmul layout, cast to bf16, fold
# the 1/sqrt(head_dim) attention scale into q, and STACK every per-layer tensor
# along a leading layer axis so a single pallas_call can index layer weights
# with the grid coordinate.  Done ONCE (not per forward).
# ---------------------------------------------------------------------------
def prepare_params(params, *, heads):
    D = params["conv1_w"].shape[0]
    dh = D // heads
    scale = 1.0 / math.sqrt(dh)
    qscale = jnp.concatenate([jnp.full((D,), scale, jnp.float32),
                              jnp.ones((2 * D,), jnp.float32)])          # (3D,)

    def stack(fn):
        return jnp.stack([fn(bp) for bp in params["blocks"]], axis=0)

    return {
        "wconv": params["conv1_w"].reshape(D, -1).T.astype(MATMUL_DTYPE),  # (C*P*P, D)
        "class_embedding": params["class_embedding"].astype(jnp.float32),
        "positional_embedding": params["positional_embedding"].astype(jnp.float32),
        "ln_pre_g": params["ln_pre_g"], "ln_pre_b": params["ln_pre_b"],
        "ln_post_g": params["ln_post_g"], "ln_post_b": params["ln_post_b"],
        "proj": params["proj"].astype(MATMUL_DTYPE),
        # stacked per-layer weights (leading layer axis)
        "ln1_g": stack(lambda bp: bp["ln1_g"]),                                      # (Ly,1,D)
        "ln1_b": stack(lambda bp: bp["ln1_b"]),
        "wqkv": stack(lambda bp: (bp["wqkv"].T * qscale[None, :]).astype(MATMUL_DTYPE)),  # (Ly,D,3D)
        "bqkv": stack(lambda bp: bp["bqkv"] * qscale[None, :]),                      # (Ly,1,3D)
        "wo":   stack(lambda bp: bp["wo"].T.astype(MATMUL_DTYPE)),                   # (Ly,D,D)
        "bo":   stack(lambda bp: bp["bo"]),
        "ln2_g": stack(lambda bp: bp["ln2_g"]),
        "ln2_b": stack(lambda bp: bp["ln2_b"]),
        "wfc":  stack(lambda bp: bp["wfc"].T.astype(MATMUL_DTYPE)),                  # (Ly,D,4D)
        "bfc":  stack(lambda bp: bp["bfc"]),
        "wpr":  stack(lambda bp: bp["wpr"].T.astype(MATMUL_DTYPE)),                  # (Ly,4D,D)
        "bpr":  stack(lambda bp: bp["bpr"]),
    }


# ---------------------------------------------------------------------------
# Forward pass (mirrors CLIPVisualEncoder.forward with use_cls_feat=True)
# ---------------------------------------------------------------------------
def clip_visual_encoder_forward(x, prep, *, patch, heads, use_cls_feat=True):
    in_dtype = x.dtype
    B, C, T, H, W = x.shape
    wconv = prep["wconv"]                   # (C*P*P, D) bf16
    K, D = wconv.shape
    h, w = H // patch, W // patch
    N, hw = B * T, h * w
    L = hw + 1
    n_layers = prep["wqkv"].shape[0]
    vmem_limit = _vmem_limit_bytes()

    pos = prep["positional_embedding"]
    if pos.shape[0] != L:
        # TODO(synk): interpolate_pos_embed_online (bicubic resize of the pos-embed grid) not implemented.
        raise NotImplementedError("positional embedding interpolation not supported")

    # (B, C, T, H, W) -> (N, hw, C*P*P) non-overlapping patches.  Cast to bf16
    # BEFORE the transpose chain so the XLA relayouts move half the HBM bytes.
    xt = jnp.transpose(x.astype(MATMUL_DTYPE), (0, 2, 1, 3, 4)).reshape(N, C, H, W)
    patches = xt.reshape(N, C, h, patch, w, patch)
    patches = jnp.transpose(patches, (0, 2, 4, 1, 3, 5)).reshape(N, hw, K)

    # --- fused conv1-as-matmul + class token + pos-embed + ln_pre ---
    seq = pl.pallas_call(
        _embed_kernel,
        out_shape=jax.ShapeDtypeStruct((N, L, D), ACT_DTYPE),
        grid=(N,),
        in_specs=[
            pl.BlockSpec((1, hw, K), lambda n: (n, 0, 0)),
            pl.BlockSpec((K, D), lambda n: (0, 0)),       # resident conv weight
            pl.BlockSpec((1, D), lambda n: (0, 0)),
            pl.BlockSpec((L, D), lambda n: (0, 0)),
            pl.BlockSpec((1, D), lambda n: (0, 0)),
            pl.BlockSpec((1, D), lambda n: (0, 0)),
        ],
        out_specs=pl.BlockSpec((1, L, D), lambda n: (n, 0, 0)),
        compiler_params=pltpu.CompilerParams(
            dimension_semantics=("parallel",), vmem_limit_bytes=vmem_limit),
    )(patches, wconv, prep["class_embedding"], pos, prep["ln_pre_g"], prep["ln_pre_b"])

    # --- transformer residual attention blocks ---
    blk_kernel = _make_resblock_kernel(heads, D // heads)
    weight_args = (prep["ln1_g"], prep["ln1_b"], prep["wqkv"], prep["bqkv"],
                   prep["wo"], prep["bo"], prep["ln2_g"], prep["ln2_b"],
                   prep["wfc"], prep["bfc"], prep["wpr"], prep["bpr"])
    w_tails = [a.shape[1:] for a in weight_args]
    scratch = [pltpu.VMEM((L, D), MATMUL_DTYPE)]       # per-head-group attention slab

    if N >= MERGED_MIN_SEQS and n_layers > 0:
        # Single pipelined call over (layers, N): layer l+1's weights prefetch under
        # layer l's last sequence, the (N, L, D) activation buffer is updated in
        # place (input_output_aliases) so layers chain with no per-layer call
        # overhead and no extra HBM copies.  Layer axis 'arbitrary', N 'parallel'.
        def wspec(tail):
            nd = len(tail)
            return pl.BlockSpec((1,) + tail, lambda l, n, _nd=nd: (l,) + (0,) * _nd)

        seq = pl.pallas_call(
            blk_kernel,
            out_shape=jax.ShapeDtypeStruct((N, L, D), ACT_DTYPE),
            grid=(n_layers, N),
            in_specs=[pl.BlockSpec((1, L, D), lambda l, n: (n, 0, 0))]
                     + [wspec(t) for t in w_tails],
            out_specs=pl.BlockSpec((1, L, D), lambda l, n: (n, 0, 0)),
            scratch_shapes=scratch,
            input_output_aliases={0: 0},
            compiler_params=pltpu.CompilerParams(
                dimension_semantics=("arbitrary", "parallel"),
                vmem_limit_bytes=vmem_limit),
        )(seq, *weight_args)
    else:
        # Fallback for very small N: one call per layer, weights resident across N.
        for l in range(n_layers):
            def wspec(tail, _l=l):
                nd = len(tail)
                return pl.BlockSpec((1,) + tail,
                                    lambda n, _l=_l, _nd=nd: (_l,) + (0,) * _nd)

            seq = pl.pallas_call(
                blk_kernel,
                out_shape=jax.ShapeDtypeStruct((N, L, D), ACT_DTYPE),
                grid=(N,),
                in_specs=[pl.BlockSpec((1, L, D), lambda n: (n, 0, 0))]
                         + [wspec(t) for t in w_tails],
                out_specs=pl.BlockSpec((1, L, D), lambda n: (n, 0, 0)),
                scratch_shapes=scratch,
                compiler_params=pltpu.CompilerParams(
                    dimension_semantics=("parallel",), vmem_limit_bytes=vmem_limit),
            )(seq, *weight_args)

    xseq = seq  # (N, L, D) == xseq in the PyTorch code

    # patch features: drop class token, (B, T, h, w, D) -> (B, D, T, h, w), cast back.
    # The PyTorch module returns the SAME final-layer tensor four times ([x, x, x, x]).
    patch_feats = xseq[:, 1:, :].reshape(B, T, h, w, D)
    patch_feats = jnp.transpose(patch_feats, (0, 4, 1, 2, 3)).astype(in_dtype)
    outputs = [patch_feats, patch_feats, patch_feats, patch_feats]

    if use_cls_feat:
        cls_tokens = xseq[:, 0, :]                      # (B*T, D)
        E = prep["proj"].shape[1]
        y = pl.pallas_call(
            _cls_head_kernel,
            out_shape=jax.ShapeDtypeStruct((B, E), jnp.float32),
        )(cls_tokens, prep["ln_post_g"], prep["ln_post_b"], prep["proj"])
        return outputs, y.astype(in_dtype)
    return outputs


# ---------------------------------------------------------------------------
# Pure-JAX f32 reference (mirrors the PyTorch forward) for a correctness gate.
# ---------------------------------------------------------------------------
def _reference_forward(x, params, *, patch, heads):
    B, C, T, H, W = x.shape
    D = params["conv1_w"].shape[0]
    h, w = H // patch, W // patch
    N, hw = B * T, h * w
    dh = D // heads

    def ln(z, g, b):
        mu = z.mean(-1, keepdims=True)
        v = ((z - mu) ** 2).mean(-1, keepdims=True)
        return (z - mu) / jnp.sqrt(v + EPS) * g + b

    wconv = params["conv1_w"].reshape(D, -1).T
    xt = jnp.transpose(x, (0, 2, 1, 3, 4)).reshape(N, C, H, W)
    p = xt.reshape(N, C, h, patch, w, patch)
    p = jnp.transpose(p, (0, 2, 4, 1, 3, 5)).reshape(N, hw, -1)
    pe = p @ wconv
    cls = jnp.broadcast_to(params["class_embedding"], (N, 1, D))
    seq = jnp.concatenate([cls, pe], axis=1) + params["positional_embedding"][None]
    seq = ln(seq, params["ln_pre_g"], params["ln_pre_b"])

    for bp in params["blocks"]:
        hln = ln(seq, bp["ln1_g"], bp["ln1_b"])
        qkv = hln @ bp["wqkv"].T + bp["bqkv"]
        q, k, v = qkv[..., :D], qkv[..., D:2 * D], qkv[..., 2 * D:]
        L = seq.shape[1]
        q = q.reshape(N, L, heads, dh).transpose(0, 2, 1, 3)
        k = k.reshape(N, L, heads, dh).transpose(0, 2, 1, 3)
        v = v.reshape(N, L, heads, dh).transpose(0, 2, 1, 3)
        s = jnp.einsum('nhqd,nhkd->nhqk', q, k) / math.sqrt(dh)
        a = jax.nn.softmax(s, axis=-1)
        o = jnp.einsum('nhqk,nhkd->nhqd', a, v).transpose(0, 2, 1, 3).reshape(N, L, D)
        seq = seq + (o @ bp["wo"].T + bp["bo"])
        h2 = ln(seq, bp["ln2_g"], bp["ln2_b"])
        f = h2 @ bp["wfc"].T + bp["bfc"]
        f = f * jax.nn.sigmoid(1.702 * f)
        seq = seq + (f @ bp["wpr"].T + bp["bpr"])

    feats = seq[:, 1:, :].reshape(B, T, h, w, D).transpose(0, 4, 1, 2, 3)
    y = ln(seq[:, 0, :], params["ln_post_g"], params["ln_post_b"]) @ params["proj"]
    y = y.reshape(B, T, -1).mean(axis=1)
    return feats, y


if __name__ == "__main__":
    # small but consistent shapes: CLIP-style tower scaled down (16x16 images, patch 4)
    B, C, T, H, W = 2, 3, 4, 16, 16     # N = B*T = 8 -> exercises the fused-layers path
    PATCH, WIDTH, HEADS, LAYERS, OUT_DIM = 4, 32, 4, 2, 16

    key = jax.random.PRNGKey(0)
    kx, kp = jax.random.split(key)
    x = jax.random.normal(kx, (B, C, T, H, W), dtype=jnp.float32)
    params = init_params(kp, width=WIDTH, patch=PATCH, in_chans=C,
                         grid=(H // PATCH, W // PATCH), layers=LAYERS, out_dim=OUT_DIM)
    prep = prepare_params(params, heads=HEADS)   # one-time transpose/cast/scale-fold/stack

    fwd = jax.jit(functools.partial(clip_visual_encoder_forward,
                                    patch=PATCH, heads=HEADS, use_cls_feat=True))
    feats, y = fwd(x, prep)
    jax.block_until_ready(feats[0])
    jax.block_until_ready(y)

    assert len(feats) == 4
    assert feats[0].shape == (B, WIDTH, T, H // PATCH, W // PATCH)
    assert feats[0].dtype == x.dtype
    assert y.shape == (B, OUT_DIM)
    assert y.dtype == x.dtype

    # correctness gate vs a pure-JAX f32 reference (loose tolerance: bf16 MXU
    # operands, bf16 activation stream, EUP approx reciprocal in the softmax)
    ref_feats, ref_y = _reference_forward(x, params, patch=PATCH, heads=HEADS)

    def rel(a, b):
        a = jnp.asarray(a, jnp.float32)
        b = jnp.asarray(b, jnp.float32)
        return float(jnp.linalg.norm(a - b) / (jnp.linalg.norm(b) + 1e-6))

    r_f = rel(feats[0], ref_feats)
    r_y = rel(y, ref_y)
    assert r_f < 5e-2, f"patch feature mismatch: rel err {r_f}"
    assert r_y < 5e-2, f"cls feature mismatch: rel err {r_y}"

    print("KERNEL_OK")
</pallas_src>

<mosaic_0001>
module attributes {stable_mosaic.version = 11 : i64} {
  func.func @_embed_kernel(%arg0: i32, %arg1: memref<1x16x48xbf16, #tpu.memory_space<vmem>>, %arg2: memref<48x32xbf16, #tpu.memory_space<vmem>>, %arg3: memref<1x32xf32, #tpu.memory_space<vmem>>, %arg4: memref<17x32xf32, #tpu.memory_space<vmem>>, %arg5: memref<1x32xf32, #tpu.memory_space<vmem>>, %arg6: memref<1x32xf32, #tpu.memory_space<vmem>>, %arg7: memref<1x17x32xbf16, #tpu.memory_space<vmem>>) attributes {dimension_semantics = [#tpu.dimension_semantics<parallel>], iteration_bounds = array<i64: 8>, scalar_prefetch = 0 : i64, scratch_operands = 0 : i64, tpu.core_type = #tpu.core_type<tc>, window_params = [{transform_indices = @transform_0, window_bounds = array<i64: 1, 16, 48>}, {pipeline_mode = #tpu.pipeline_mode<synchronous>, transform_indices = @transform_1, window_bounds = array<i64: 48, 32>}, {pipeline_mode = #tpu.pipeline_mode<synchronous>, transform_indices = @transform_2, window_bounds = array<i64: 1, 32>}, {pipeline_mode = #tpu.pipeline_mode<synchronous>, transform_indices = @transform_3, window_bounds = array<i64: 17, 32>}, {pipeline_mode = #tpu.pipeline_mode<synchronous>, transform_indices = @transform_4, window_bounds = array<i64: 1, 32>}, {pipeline_mode = #tpu.pipeline_mode<synchronous>, transform_indices = @transform_5, window_bounds = array<i64: 1, 32>}, {transform_indices = @transform_6, window_bounds = array<i64: 1, 17, 32>}]} {
    %c0 = arith.constant 0 : index
    %c0_0 = arith.constant 0 : index
    %c0_1 = arith.constant 0 : index
    %0 = vector.load %arg1[%c0, %c0_0, %c0_1] : memref<1x16x48xbf16, #tpu.memory_space<vmem>>, vector<1x16x48xbf16>
    %1 = vector.shape_cast %0 : vector<1x16x48xbf16> to vector<16x48xbf16>
    %c0_2 = arith.constant 0 : index
    %c0_3 = arith.constant 0 : index
    %2 = vector.load %arg2[%c0_2, %c0_3] : memref<48x32xbf16, #tpu.memory_space<vmem>>, vector<48x32xbf16>
    %cst = arith.constant dense<0.000000e+00> : vector<16x32xf32>
    %3 = tpu.matmul %1, %2, %cst {dimension_numbers = #tpu.dot_dimension_numbers<[1], [0], [0], [1], [0, 0, 1, 1], [], []>} : vector<16x48xbf16>, vector<48x32xbf16>, vector<16x32xf32> -> vector<16x32xf32>
    %c0_4 = arith.constant 0 : index
    %c0_5 = arith.constant 0 : index
    %4 = vector.load %arg3[%c0_4, %c0_5] : memref<1x32xf32, #tpu.memory_space<vmem>>, vector<1x32xf32>
    %5 = tpu.concatenate %4, %3 in 0 : vector<1x32xf32>, vector<16x32xf32> -> vector<17x32xf32>
    %c0_6 = arith.constant 0 : index
    %c0_7 = arith.constant 0 : index
    %6 = vector.load %arg4[%c0_6, %c0_7] : memref<17x32xf32, #tpu.memory_space<vmem>>, vector<17x32xf32>
    %7 = arith.addf %5, %6 : vector<17x32xf32>
    %c0_8 = arith.constant 0 : index
    %c0_9 = arith.constant 0 : index
    %8 = vector.load %arg5[%c0_8, %c0_9] : memref<1x32xf32, #tpu.memory_space<vmem>>, vector<1x32xf32>
    %c0_10 = arith.constant 0 : index
    %c0_11 = arith.constant 0 : index
    %9 = vector.load %arg6[%c0_10, %c0_11] : memref<1x32xf32, #tpu.memory_space<vmem>>, vector<1x32xf32>
    %cst_12 = arith.constant dense<0.000000e+00> : vector<17xf32>
    %10 = vector.multi_reduction <add>, %7, %cst_12 [1] : vector<17x32xf32> to vector<17xf32>
    %11 = vector.shape_cast %10 : vector<17xf32> to vector<17x1xf32>
    %cst_13 = arith.constant 3.200000e+01 : f32
    %12 = vector.broadcast %cst_13 : f32 to vector<17x1xf32>
    %13 = arith.divf %11, %12 : vector<17x1xf32>
    %14 = vector.broadcast %13 : vector<17x1xf32> to vector<17x32xf32>
    %15 = arith.subf %7, %14 : vector<17x32xf32>
    %16 = arith.mulf %15, %15 : vector<17x32xf32>
    %cst_14 = arith.constant dense<0.000000e+00> : vector<17xf32>
    %17 = vector.multi_reduction <add>, %16, %cst_14 [1] : vector<17x32xf32> to vector<17xf32>
    %18 = vector.shape_cast %17 : vector<17xf32> to vector<17x1xf32>
    %cst_15 = arith.constant 3.200000e+01 : f32
    %19 = vector.broadcast %cst_15 : f32 to vector<17x1xf32>
    %20 = arith.divf %18, %19 : vector<17x1xf32>
    %cst_16 = arith.constant 9.99999974E-6 : f32
    %21 = vector.broadcast %cst_16 : f32 to vector<17x1xf32>
    %22 = arith.addf %20, %21 : vector<17x1xf32>
    %23 = math.rsqrt %22 : vector<17x1xf32>
    %24 = vector.broadcast %23 : vector<17x1xf32> to vector<17x32xf32>
    %25 = arith.mulf %15, %24 : vector<17x32xf32>
    %26 = vector.broadcast %8 : vector<1x32xf32> to vector<17x32xf32>
    %27 = arith.mulf %25, %26 : vector<17x32xf32>
    %28 = vector.broadcast %9 : vector<1x32xf32> to vector<17x32xf32>
    %29 = arith.addf %27, %28 : vector<17x32xf32>
    %30 = arith.truncf %29 : vector<17x32xf32> to vector<17x32xbf16>
    %c0_17 = arith.constant 0 : index
    %c0_18 = arith.constant 0 : index
    %c0_19 = arith.constant 0 : index
    %31 = vector.load %arg7[%c0_17, %c0_18, %c0_19] : memref<1x17x32xbf16, #tpu.memory_space<vmem>>, vector<1x17x32xbf16>
    %32 = vector.shape_cast %31 : vector<1x17x32xbf16> to vector<17x32xbf16>
    %33 = vector.shape_cast %30 : vector<17x32xbf16> to vector<1x17x32xbf16>
    tpu.vector_store %arg7[%c0_17, %c0_18, %c0_19], %33 {strides = array<i32>} : memref<1x17x32xbf16, #tpu.memory_space<vmem>>, vector<1x17x32xbf16>,
    return
  }
  func.func @transform_0(%arg0: i32) -> (i32, i32, i32) {
    %c0_i32 = arith.constant 0 : i32
    %c0_i32_0 = arith.constant 0 : i32
    %c0_i32_1 = arith.constant 0 : i32
    return %arg0, %c0_i32, %c0_i32_0 : i32, i32, i32
  }
  func.func @transform_1(%arg0: i32) -> (i32, i32) {
    %c0_i32 = arith.constant 0 : i32
    %c0_i32_0 = arith.constant 0 : i32
    %c0_i32_1 = arith.constant 0 : i32
    return %c0_i32, %c0_i32_0 : i32, i32
  }
  func.func @transform_2(%arg0: i32) -> (i32, i32) {
    %c0_i32 = arith.constant 0 : i32
    %c0_i32_0 = arith.constant 0 : i32
    %c0_i32_1 = arith.constant 0 : i32
    return %c0_i32, %c0_i32_0 : i32, i32
  }
  func.func @transform_3(%arg0: i32) -> (i32, i32) {
    %c0_i32 = arith.constant 0 : i32
    %c0_i32_0 = arith.constant 0 : i32
    %c0_i32_1 = arith.constant 0 : i32
    return %c0_i32, %c0_i32_0 : i32, i32
  }
  func.func @transform_4(%arg0: i32) -> (i32, i32) {
    %c0_i32 = arith.constant 0 : i32
    %c0_i32_0 = arith.constant 0 : i32
    %c0_i32_1 = arith.constant 0 : i32
    return %c0_i32, %c0_i32_0 : i32, i32
  }
  func.func @transform_5(%arg0: i32) -> (i32, i32) {
    %c0_i32 = arith.constant 0 : i32
    %c0_i32_0 = arith.constant 0 : i32
    %c0_i32_1 = arith.constant 0 : i32
    return %c0_i32, %c0_i32_0 : i32, i32
  }
  func.func @transform_6(%arg0: i32) -> (i32, i32, i32) {
    %c0_i32 = arith.constant 0 : i32
    %c0_i32_0 = arith.constant 0 : i32
    %c0_i32_1 = arith.constant 0 : i32
    return %arg0, %c0_i32, %c0_i32_0 : i32, i32, i32
  }
}

module attributes {stable_mosaic.version = 11 : i64} {
  func.func @kernel(%arg0: i32, %arg1: i32, %arg2: memref<1x17x32xbf16, #tpu.memory_space<vmem>>, %arg3: memref<1x1x32xf32, #tpu.memory_space<vmem>>, %arg4: memref<1x1x32xf32, #tpu.memory_space<vmem>>, %arg5: memref<1x32x96xbf16, #tpu.memory_space<vmem>>, %arg6: memref<1x1x96xf32, #tpu.memory_space<vmem>>, %arg7: memref<1x32x32xbf16, #tpu.memory_space<vmem>>, %arg8: memref<1x1x32xf32, #tpu.memory_space<vmem>>, %arg9: memref<1x1x32xf32, #tpu.memory_space<vmem>>, %arg10: memref<1x1x32xf32, #tpu.memory_space<vmem>>, %arg11: memref<1x32x128xbf16, #tpu.memory_space<vmem>>, %arg12: memref<1x1x128xf32, #tpu.memory_space<vmem>>, %arg13: memref<1x128x32xbf16, #tpu.memory_space<vmem>>, %arg14: memref<1x1x32xf32, #tpu.memory_space<vmem>>, %arg15: memref<1x17x32xbf16, #tpu.memory_space<vmem>>, %arg16: memref<17x32xbf16, #tpu.memory_space<vmem>>) attributes {dimension_semantics = [#tpu.dimension_semantics<arbitrary>, #tpu.dimension_semantics<parallel>], iteration_bounds = array<i64: 2, 8>, scalar_prefetch = 0 : i64, scratch_operands = 1 : i64, tpu.core_type = #tpu.core_type<tc>, window_params = [{transform_indices = @transform_0, window_bounds = array<i64: 1, 17, 32>}, {transform_indices = @transform_1, window_bounds = array<i64: 1, 1, 32>}, {transform_indices = @transform_2, window_bounds = array<i64: 1, 1, 32>}, {transform_indices = @transform_3, window_bounds = array<i64: 1, 32, 96>}, {transform_indices = @transform_4, window_bounds = array<i64: 1, 1, 96>}, {transform_indices = @transform_5, window_bounds = array<i64: 1, 32, 32>}, {transform_indices = @transform_6, window_bounds = array<i64: 1, 1, 32>}, {transform_indices = @transform_7, window_bounds = array<i64: 1, 1, 32>}, {transform_indices = @transform_8, window_bounds = array<i64: 1, 1, 32>}, {transform_indices = @transform_9, window_bounds = array<i64: 1, 32, 128>}, {transform_indices = @transform_10, window_bounds = array<i64: 1, 1, 128>}, {transform_indices = @transform_11, window_bounds = array<i64: 1, 128, 32>}, {transform_indices = @transform_12, window_bounds = array<i64: 1, 1, 32>}, {transform_indices = @transform_13, window_bounds = array<i64: 1, 17, 32>}]} {
    %c0 = arith.constant 0 : index
    %c0_0 = arith.constant 0 : index
    %c0_1 = arith.constant 0 : index
    %0 = vector.load %arg2[%c0, %c0_0, %c0_1] : memref<1x17x32xbf16, #tpu.memory_space<vmem>>, vector<1x17x32xbf16>
    %1 = vector.shape_cast %0 : vector<1x17x32xbf16> to vector<17x32xbf16>
    %2 = arith.extf %1 : vector<17x32xbf16> to vector<17x32xf32>
    %c0_2 = arith.constant 0 : index
    %c0_3 = arith.constant 0 : index
    %c0_4 = arith.constant 0 : index
    %3 = vector.load %arg3[%c0_2, %c0_3, %c0_4] : memref<1x1x32xf32, #tpu.memory_space<vmem>>, vector<1x1x32xf32>
    %4 = vector.shape_cast %3 : vector<1x1x32xf32> to vector<1x32xf32>
    %c0_5 = arith.constant 0 : index
    %c0_6 = arith.constant 0 : index
    %c0_7 = arith.constant 0 : index
    %5 = vector.load %arg4[%c0_5, %c0_6, %c0_7] : memref<1x1x32xf32, #tpu.memory_space<vmem>>, vector<1x1x32xf32>
    %6 = vector.shape_cast %5 : vector<1x1x32xf32> to vector<1x32xf32>
    %cst = arith.constant dense<0.000000e+00> : vector<17xf32>
    %7 = vector.multi_reduction <add>, %2, %cst [1] : vector<17x32xf32> to vector<17xf32>
    %8 = vector.shape_cast %7 : vector<17xf32> to vector<17x1xf32>
    %cst_8 = arith.constant 3.200000e+01 : f32
    %9 = vector.broadcast %cst_8 : f32 to vector<17x1xf32>
    %10 = arith.divf %8, %9 : vector<17x1xf32>
    %11 = vector.broadcast %10 : vector<17x1xf32> to vector<17x32xf32>
    %12 = arith.subf %2, %11 : vector<17x32xf32>
    %13 = arith.mulf %12, %12 : vector<17x32xf32>
    %cst_9 = arith.constant dense<0.000000e+00> : vector<17xf32>
    %14 = vector.multi_reduction <add>, %13, %cst_9 [1] : vector<17x32xf32> to vector<17xf32>
    %15 = vector.shape_cast %14 : vector<17xf32> to vector<17x1xf32>
    %cst_10 = arith.constant 3.200000e+01 : f32
    %16 = vector.broadcast %cst_10 : f32 to vector<17x1xf32>
    %17 = arith.divf %15, %16 : vector<17x1xf32>
    %cst_11 = arith.constant 9.99999974E-6 : f32
    %18 = vector.broadcast %cst_11 : f32 to vector<17x1xf32>
    %19 = arith.addf %17, %18 : vector<17x1xf32>
    %20 = math.rsqrt %19 : vector<17x1xf32>
    %21 = vector.broadcast %20 : vector<17x1xf32> to vector<17x32xf32>
    %22 = arith.mulf %12, %21 : vector<17x32xf32>
    %23 = vector.broadcast %4 : vector<1x32xf32> to vector<17x32xf32>
    %24 = arith.mulf %22, %23 : vector<17x32xf32>
    %25 = vector.broadcast %6 : vector<1x32xf32> to vector<17x32xf32>
    %26 = arith.addf %24, %25 : vector<17x32xf32>
    %27 = arith.truncf %26 : vector<17x32xf32> to vector<17x32xbf16>
    %c0_12 = arith.constant 0 : index
    %c0_13 = arith.constant 0 : index
    %c0_14 = arith.constant 0 : index
    %28 = vector.load %arg5[%c0_12, %c0_13, %c0_14] : memref<1x32x96xbf16, #tpu.memory_space<vmem>>, vector<1x32x96xbf16>
    %29 = vector.shape_cast %28 : vector<1x32x96xbf16> to vector<32x96xbf16>
    %cst_15 = arith.constant dense<0.000000e+00> : vector<17x96xf32>
    %30 = tpu.matmul %27, %29, %cst_15 {dimension_numbers = #tpu.dot_dimension_numbers<[1], [0], [0], [1], [0, 0, 1, 1], [], []>} : vector<17x32xbf16>, vector<32x96xbf16>, vector<17x96xf32> -> vector<17x96xf32>
    %c0_16 = arith.constant 0 : index
    %c0_17 = arith.constant 0 : index
    %c0_18 = arith.constant 0 : index
    %31 = vector.load %arg6[%c0_16, %c0_17, %c0_18] : memref<1x1x96xf32, #tpu.memory_space<vmem>>, vector<1x1x96xf32>
    %32 = vector.shape_cast %31 : vector<1x1x96xf32> to vector<1x96xf32>
    %33 = vector.broadcast %32 : vector<1x96xf32> to vector<17x96xf32>
    %34 = arith.addf %30, %33 : vector<17x96xf32>
    %35 = vector.extract_strided_slice %34 {offsets = [0, 32], sizes = [17, 32], strides = [1, 1]} : vector<17x96xf32> to vector<17x32xf32>
    %36 = tpu.transpose %35, [1, 0] : vector<17x32xf32> -> vector<32x17xf32>
    %37 = arith.truncf %36 : vector<32x17xf32> to vector<32x17xbf16>
    %38 = arith.truncf %34 : vector<17x96xf32> to vector<17x96xbf16>
    %39 = vector.extract_strided_slice %38 {offsets = [0, 0], sizes = [17, 8], strides = [1, 1]} : vector<17x96xbf16> to vector<17x8xbf16>
    %40 = vector.extract_strided_slice %38 {offsets = [0, 64], sizes = [17, 8], strides = [1, 1]} : vector<17x96xbf16> to vector<17x8xbf16>
    %41 = vector.extract_strided_slice %37 {offsets = [0, 0], sizes = [8, 17], strides = [1, 1]} : vector<32x17xbf16> to vector<8x17xbf16>
    %cst_19 = arith.constant dense<0.000000e+00> : vector<17x17xf32>
    %42 = tpu.matmul %39, %41, %cst_19 {dimension_numbers = #tpu.dot_dimension_numbers<[1], [0], [0], [1], [0, 0, 1, 1], [], []>} : vector<17x8xbf16>, vector<8x17xbf16>, vector<17x17xf32> -> vector<17x17xf32>
    %cst_20 = arith.constant dense<0xFF800000> : vector<17xf32>
    %43 = vector.multi_reduction <maximumf>, %42, %cst_20 [1] : vector<17x17xf32> to vector<17xf32>
    %44 = vector.shape_cast %43 : vector<17xf32> to vector<17x1xf32>
    %45 = vector.broadcast %44 : vector<17x1xf32> to vector<17x17xf32>
    %46 = arith.subf %42, %45 : vector<17x17xf32>
    %47 = math.exp %46 : vector<17x17xf32>
    %cst_21 = arith.constant dense<0.000000e+00> : vector<17xf32>
    %48 = vector.multi_reduction <add>, %47, %cst_21 [1] : vector<17x17xf32> to vector<17xf32>
    %49 = vector.shape_cast %48 : vector<17xf32> to vector<17x1xf32>
    %50 = tpu.reciprocal %49 {approx = true} : vector<17x1xf32> -> vector<17x1xf32>
    %51 = vector.broadcast %50 : vector<17x1xf32> to vector<17x17xf32>
    %52 = arith.mulf %47, %51 : vector<17x17xf32>
    %53 = arith.truncf %52 : vector<17x17xf32> to vector<17x17xbf16>
    %cst_22 = arith.constant dense<0.000000e+00> : vector<17x8xf32>
    %54 = tpu.matmul %53, %40, %cst_22 {dimension_numbers = #tpu.dot_dimension_numbers<[1], [0], [0], [1], [0, 0, 1, 1], [], []>} : vector<17x17xbf16>, vector<17x8xbf16>, vector<17x8xf32> -> vector<17x8xf32>
    %55 = vector.extract_strided_slice %38 {offsets = [0, 8], sizes = [17, 8], strides = [1, 1]} : vector<17x96xbf16> to vector<17x8xbf16>
    %56 = vector.extract_strided_slice %38 {offsets = [0, 72], sizes = [17, 8], strides = [1, 1]} : vector<17x96xbf16> to vector<17x8xbf16>
    %57 = vector.extract_strided_slice %37 {offsets = [8, 0], sizes = [8, 17], strides = [1, 1]} : vector<32x17xbf16> to vector<8x17xbf16>
    %cst_23 = arith.constant dense<0.000000e+00> : vector<17x17xf32>
    %58 = tpu.matmul %55, %57, %cst_23 {dimension_numbers = #tpu.dot_dimension_numbers<[1], [0], [0], [1], [0, 0, 1, 1], [], []>} : vector<17x8xbf16>, vector<8x17xbf16>, vector<17x17xf32> -> vector<17x17xf32>
    %cst_24 = arith.constant dense<0xFF800000> : vector<17xf32>
    %59 = vector.multi_reduction <maximumf>, %58, %cst_24 [1] : vector<17x17xf32> to vector<17xf32>
    %60 = vector.shape_cast %59 : vector<17xf32> to vector<17x1xf32>
    %61 = vector.broadcast %60 : vector<17x1xf32> to vector<17x17xf32>
    %62 = arith.subf %58, %61 : vector<17x17xf32>
    %63 = math.exp %62 : vector<17x17xf32>
    %cst_25 = arith.constant dense<0.000000e+00> : vector<17xf32>
    %64 = vector.multi_reduction <add>, %63, %cst_25 [1] : vector<17x17xf32> to vector<17xf32>
    %65 = vector.shape_cast %64 : vector<17xf32> to vector<17x1xf32>
    %66 = tpu.reciprocal %65 {approx = true} : vector<17x1xf32> -> vector<17x1xf32>
    %67 = vector.broadcast %66 : vector<17x1xf32> to vector<17x17xf32>
    %68 = arith.mulf %63, %67 : vector<17x17xf32>
    %69 = arith.truncf %68 : vector<17x17xf32> to vector<17x17xbf16>
    %cst_26 = arith.constant dense<0.000000e+00> : vector<17x8xf32>
    %70 = tpu.matmul %69, %56, %cst_26 {dimension_numbers = #tpu.dot_dimension_numbers<[1], [0], [0], [1], [0, 0, 1, 1], [], []>} : vector<17x17xbf16>, vector<17x8xbf16>, vector<17x8xf32> -> vector<17x8xf32>
    %71 = vector.extract_strided_slice %38 {offsets = [0, 16], sizes = [17, 8], strides = [1, 1]} : vector<17x96xbf16> to vector<17x8xbf16>
    %72 = vector.extract_strided_slice %38 {offsets = [0, 80], sizes = [17, 8], strides = [1, 1]} : vector<17x96xbf16> to vector<17x8xbf16>
    %73 = vector.extract_strided_slice %37 {offsets = [16, 0], sizes = [8, 17], strides = [1, 1]} : vector<32x17xbf16> to vector<8x17xbf16>
    %cst_27 = arith.constant dense<0.000000e+00> : vector<17x17xf32>
    %74 = tpu.matmul %71, %73, %cst_27 {dimension_numbers = #tpu.dot_dimension_numbers<[1], [0], [0], [1], [0, 0, 1, 1], [], []>} : vector<17x8xbf16>, vector<8x17xbf16>, vector<17x17xf32> -> vector<17x17xf32>
    %cst_28 = arith.constant dense<0xFF800000> : vector<17xf32>
    %75 = vector.multi_reduction <maximumf>, %74, %cst_28 [1] : vector<17x17xf32> to vector<17xf32>
    %76 = vector.shape_cast %75 : vector<17xf32> to vector<17x1xf32>
    %77 = vector.broadcast %76 : vector<17x1xf32> to vector<17x17xf32>
    %78 = arith.subf %74, %77 : vector<17x17xf32>
    %79 = math.exp %78 : vector<17x17xf32>
    %cst_29 = arith.constant dense<0.000000e+00> : vector<17xf32>
    %80 = vector.multi_reduction <add>, %79, %cst_29 [1] : vector<17x17xf32> to vector<17xf32>
    %81 = vector.shape_cast %80 : vector<17xf32> to vector<17x1xf32>
    %82 = tpu.reciprocal %81 {approx = true} : vector<17x1xf32> -> vector<17x1xf32>
    %83 = vector.broadcast %82 : vector<17x1xf32> to vector<17x17xf32>
    %84 = arith.mulf %79, %83 : vector<17x17xf32>
    %85 = arith.truncf %84 : vector<17x17xf32> to vector<17x17xbf16>
    %cst_30 = arith.constant dense<0.000000e+00> : vector<17x8xf32>
    %86 = tpu.matmul %85, %72, %cst_30 {dimension_numbers = #tpu.dot_dimension_numbers<[1], [0], [0], [1], [0, 0, 1, 1], [], []>} : vector<17x17xbf16>, vector<17x8xbf16>, vector<17x8xf32> -> vector<17x8xf32>
    %87 = vector.extract_strided_slice %38 {offsets = [0, 24], sizes = [17, 8], strides = [1, 1]} : vector<17x96xbf16> to vector<17x8xbf16>
    %88 = vector.extract_strided_slice %38 {offsets = [0, 88], sizes = [17, 8], strides = [1, 1]} : vector<17x96xbf16> to vector<17x8xbf16>
    %89 = vector.extract_strided_slice %37 {offsets = [24, 0], sizes = [8, 17], strides = [1, 1]} : vector<32x17xbf16> to vector<8x17xbf16>
    %cst_31 = arith.constant dense<0.000000e+00> : vector<17x17xf32>
    %90 = tpu.matmul %87, %89, %cst_31 {dimension_numbers = #tpu.dot_dimension_numbers<[1], [0], [0], [1], [0, 0, 1, 1], [], []>} : vector<17x8xbf16>, vector<8x17xbf16>, vector<17x17xf32> -> vector<17x17xf32>
    %cst_32 = arith.constant dense<0xFF800000> : vector<17xf32>
    %91 = vector.multi_reduction <maximumf>, %90, %cst_32 [1] : vector<17x17xf32> to vector<17xf32>
    %92 = vector.shape_cast %91 : vector<17xf32> to vector<17x1xf32>
    %93 = vector.broadcast %92 : vector<17x1xf32> to vector<17x17xf32>
    %94 = arith.subf %90, %93 : vector<17x17xf32>
    %95 = math.exp %94 : vector<17x17xf32>
    %cst_33 = arith.constant dense<0.000000e+00> : vector<17xf32>
    %96 = vector.multi_reduction <add>, %95, %cst_33 [1] : vector<17x17xf32> to vector<17xf32>
    %97 = vector.shape_cast %96 : vector<17xf32> to vector<17x1xf32>
    %98 = tpu.reciprocal %97 {approx = true} : vector<17x1xf32> -> vector<17x1xf32>
    %99 = vector.broadcast %98 : vector<17x1xf32> to vector<17x17xf32>
    %100 = arith.mulf %95, %99 : vector<17x17xf32>
    %101 = arith.truncf %100 : vector<17x17xf32> to vector<17x17xbf16>
    %cst_34 = arith.constant dense<0.000000e+00> : vector<17x8xf32>
    %102 = tpu.matmul %101, %88, %cst_34 {dimension_numbers = #tpu.dot_dimension_numbers<[1], [0], [0], [1], [0, 0, 1, 1], [], []>} : vector<17x17xbf16>, vector<17x8xbf16>, vector<17x8xf32> -> vector<17x8xf32>
    %103 = tpu.concatenate %54, %70, %86, %102 in 1 : vector<17x8xf32>, vector<17x8xf32>, vector<17x8xf32>, vector<17x8xf32> -> vector<17x32xf32>
    %104 = arith.truncf %103 : vector<17x32xf32> to vector<17x32xbf16>
    %c0_35 = arith.constant 0 : index
    %c0_36 = arith.constant 0 : index
    %105 = vector.load %arg16[%c0_35, %c0_36] : memref<17x32xbf16, #tpu.memory_space<vmem>>, vector<17x32xbf16>
    tpu.vector_store %arg16[%c0_35, %c0_36], %104 {strides = array<i32>} : memref<17x32xbf16, #tpu.memory_space<vmem>>, vector<17x32xbf16>,
    %c0_37 = arith.constant 0 : index
    %c0_38 = arith.constant 0 : index
    %106 = vector.load %arg16[%c0_37, %c0_38] : memref<17x32xbf16, #tpu.memory_space<vmem>>, vector<17x32xbf16>
    %c0_39 = arith.constant 0 : index
    %c0_40 = arith.constant 0 : index
    %c0_41 = arith.constant 0 : index
    %107 = vector.load %arg7[%c0_39, %c0_40, %c0_41] : memref<1x32x32xbf16, #tpu.memory_space<vmem>>, vector<1x32x32xbf16>
    %108 = vector.shape_cast %107 : vector<1x32x32xbf16> to vector<32x32xbf16>
    %cst_42 = arith.constant dense<0.000000e+00> : vector<17x32xf32>
    %109 = tpu.matmul %106, %108, %cst_42 {dimension_numbers = #tpu.dot_dimension_numbers<[1], [0], [0], [1], [0, 0, 1, 1], [], []>} : vector<17x32xbf16>, vector<32x32xbf16>, vector<17x32xf32> -> vector<17x32xf32>
    %c0_43 = arith.constant 0 : index
    %c0_44 = arith.constant 0 : index
    %c0_45 = arith.constant 0 : index
    %110 = vector.load %arg8[%c0_43, %c0_44, %c0_45] : memref<1x1x32xf32, #tpu.memory_space<vmem>>, vector<1x1x32xf32>
    %111 = vector.shape_cast %110 : vector<1x1x32xf32> to vector<1x32xf32>
    %112 = vector.broadcast %111 : vector<1x32xf32> to vector<17x32xf32>
    %113 = arith.addf %109, %112 : vector<17x32xf32>
    %114 = arith.addf %2, %113 : vector<17x32xf32>
    %c0_46 = arith.constant 0 : index
    %c0_47 = arith.constant 0 : index
    %c0_48 = arith.constant 0 : index
    %115 = vector.load %arg9[%c0_46, %c0_47, %c0_48] : memref<1x1x32xf32, #tpu.memory_space<vmem>>, vector<1x1x32xf32>
    %116 = vector.shape_cast %115 : vector<1x1x32xf32> to vector<1x32xf32>
    %c0_49 = arith.constant 0 : index
    %c0_50 = arith.constant 0 : index
    %c0_51 = arith.constant 0 : index
    %117 = vector.load %arg10[%c0_49, %c0_50, %c0_51] : memref<1x1x32xf32, #tpu.memory_space<vmem>>, vector<1x1x32xf32>
    %118 = vector.shape_cast %117 : vector<1x1x32xf32> to vector<1x32xf32>
    %cst_52 = arith.constant dense<0.000000e+00> : vector<17xf32>
    %119 = vector.multi_reduction <add>, %114, %cst_52 [1] : vector<17x32xf32> to vector<17xf32>
    %120 = vector.shape_cast %119 : vector<17xf32> to vector<17x1xf32>
    %cst_53 = arith.constant 3.200000e+01 : f32
    %121 = vector.broadcast %cst_53 : f32 to vector<17x1xf32>
    %122 = arith.divf %120, %121 : vector<17x1xf32>
    %123 = vector.broadcast %122 : vector<17x1xf32> to vector<17x32xf32>
    %124 = arith.subf %114, %123 : vector<17x32xf32>
    %125 = arith.mulf %124, %124 : vector<17x32xf32>
    %cst_54 = arith.constant dense<0.000000e+00> : vector<17xf32>
    %126 = vector.multi_reduction <add>, %125, %cst_54 [1] : vector<17x32xf32> to vector<17xf32>
    %127 = vector.shape_cast %126 : vector<17xf32> to vector<17x1xf32>
    %cst_55 = arith.constant 3.200000e+01 : f32
    %128 = vector.broadcast %cst_55 : f32 to vector<17x1xf32>
    %129 = arith.divf %127, %128 : vector<17x1xf32>
    %cst_56 = arith.constant 9.99999974E-6 : f32
    %130 = vector.broadcast %cst_56 : f32 to vector<17x1xf32>
    %131 = arith.addf %129, %130 : vector<17x1xf32>
    %132 = math.rsqrt %131 : vector<17x1xf32>
    %133 = vector.broadcast %132 : vector<17x1xf32> to vector<17x32xf32>
    %134 = arith.mulf %124, %133 : vector<17x32xf32>
    %135 = vector.broadcast %116 : vector<1x32xf32> to vector<17x32xf32>
    %136 = arith.mulf %134, %135 : vector<17x32xf32>
    %137 = vector.broadcast %118 : vector<1x32xf32> to vector<17x32xf32>
    %138 = arith.addf %136, %137 : vector<17x32xf32>
    %139 = arith.truncf %138 : vector<17x32xf32> to vector<17x32xbf16>
    %c0_57 = arith.constant 0 : index
    %c0_58 = arith.constant 0 : index
    %c0_59 = arith.constant 0 : index
    %140 = vector.load %arg11[%c0_57, %c0_58, %c0_59] : memref<1x32x128xbf16, #tpu.memory_space<vmem>>, vector<1x32x128xbf16>
    %141 = vector.shape_cast %140 : vector<1x32x128xbf16> to vector<32x128xbf16>
    %cst_60 = arith.constant dense<0.000000e+00> : vector<17x128xf32>
    %142 = tpu.matmul %139, %141, %cst_60 {dimension_numbers = #tpu.dot_dimension_numbers<[1], [0], [0], [1], [0, 0, 1, 1], [], []>} : vector<17x32xbf16>, vector<32x128xbf16>, vector<17x128xf32> -> vector<17x128xf32>
    %c0_61 = arith.constant 0 : index
    %c0_62 = arith.constant 0 : index
    %c0_63 = arith.constant 0 : index
    %143 = vector.load %arg12[%c0_61, %c0_62, %c0_63] : memref<1x1x128xf32, #tpu.memory_space<vmem>>, vector<1x1x128xf32>
    %144 = vector.shape_cast %143 : vector<1x1x128xf32> to vector<1x128xf32>
    %145 = vector.broadcast %144 : vector<1x128xf32> to vector<17x128xf32>
    %146 = arith.addf %142, %145 : vector<17x128xf32>
    %cst_64 = arith.constant 1.702000e+00 : f32
    %147 = vector.broadcast %cst_64 : f32 to vector<17x128xf32>
    %148 = arith.mulf %147, %146 : vector<17x128xf32>
    %149 = arith.negf %148 : vector<17x128xf32>
    %150 = math.exp %149 : vector<17x128xf32>
    %cst_65 = arith.constant 1.000000e+00 : f32
    %151 = vector.broadcast %cst_65 : f32 to vector<17x128xf32>
    %152 = arith.addf %151, %150 : vector<17x128xf32>
    %153 = arith.divf %151, %152 : vector<17x128xf32>
    %154 = arith.mulf %146, %153 : vector<17x128xf32>
    %155 = arith.truncf %154 : vector<17x128xf32> to vector<17x128xbf16>
    %c0_66 = arith.constant 0 : index
    %c0_67 = arith.constant 0 : index
    %c0_68 = arith.constant 0 : index
    %156 = vector.load %arg13[%c0_66, %c0_67, %c0_68] : memref<1x128x32xbf16, #tpu.memory_space<vmem>>, vector<1x128x32xbf16>
    %157 = vector.shape_cast %156 : vector<1x128x32xbf16> to vector<128x32xbf16>
    %cst_69 = arith.constant dense<0.000000e+00> : vector<17x32xf32>
    %158 = tpu.matmul %155, %157, %cst_69 {dimension_numbers = #tpu.dot_dimension_numbers<[1], [0], [0], [1], [0, 0, 1, 1], [], []>} : vector<17x128xbf16>, vector<128x32xbf16>, vector<17x32xf32> -> vector<17x32xf32>
    %c0_70 = arith.constant 0 : index
    %c0_71 = arith.constant 0 : index
    %c0_72 = arith.constant 0 : index
    %159 = vector.load %arg14[%c0_70, %c0_71, %c0_72] : memref<1x1x32xf32, #tpu.memory_space<vmem>>, vector<1x1x32xf32>
    %160 = vector.shape_cast %159 : vector<1x1x32xf32> to vector<1x32xf32>
    %161 = vector.broadcast %160 : vector<1x32xf32> to vector<17x32xf32>
    %162 = arith.addf %158, %161 : vector<17x32xf32>
    %163 = arith.addf %114, %162 : vector<17x32xf32>
    %164 = arith.truncf %163 : vector<17x32xf32> to vector<17x32xbf16>
    %c0_73 = arith.constant 0 : index
    %c0_74 = arith.constant 0 : index
    %c0_75 = arith.constant 0 : index
    %165 = vector.load %arg15[%c0_73, %c0_74, %c0_75] : memref<1x17x32xbf16, #tpu.memory_space<vmem>>, vector<1x17x32xbf16>
    %166 = vector.shape_cast %165 : vector<1x17x32xbf16> to vector<17x32xbf16>
    %167 = vector.shape_cast %164 : vector<17x32xbf16> to vector<1x17x32xbf16>
    tpu.vector_store %arg15[%c0_73, %c0_74, %c0_75], %167 {strides = array<i32>} : memref<1x17x32xbf16, #tpu.memory_space<vmem>>, vector<1x17x32xbf16>,
    return
  }
  func.func @transform_0(%arg0: i32, %arg1: i32) -> (i32, i32, i32) {
    %c0_i32 = arith.constant 0 : i32
    %c0_i32_0 = arith.constant 0 : i32
    %c0_i32_1 = arith.constant 0 : i32
    return %arg1, %c0_i32, %c0_i32_0 : i32, i32, i32
  }
  func.func @transform_1(%arg0: i32, %arg1: i32) -> (i32, i32, i32) {
    %c0_i32 = arith.constant 0 : i32
    %c0_i32_0 = arith.constant 0 : i32
    %c0_i32_1 = arith.constant 0 : i32
    return %arg0, %c0_i32, %c0_i32_0 : i32, i32, i32
  }
  func.func @transform_2(%arg0: i32, %arg1: i32) -> (i32, i32, i32) {
    %c0_i32 = arith.constant 0 : i32
    %c0_i32_0 = arith.constant 0 : i32
    %c0_i32_1 = arith.constant 0 : i32
    return %arg0, %c0_i32, %c0_i32_0 : i32, i32, i32
  }
  func.func @transform_3(%arg0: i32, %arg1: i32) -> (i32, i32, i32) {
    %c0_i32 = arith.constant 0 : i32
    %c0_i32_0 = arith.constant 0 : i32
    %c0_i32_1 = arith.constant 0 : i32
    return %arg0, %c0_i32, %c0_i32_0 : i32, i32, i32
  }
  func.func @transform_4(%arg0: i32, %arg1: i32) -> (i32, i32, i32) {
    %c0_i32 = arith.constant 0 : i32
    %c0_i32_0 = arith.constant 0 : i32
    %c0_i32_1 = arith.constant 0 : i32
    return %arg0, %c0_i32, %c0_i32_0 : i32, i32, i32
  }
  func.func @transform_5(%arg0: i32, %arg1: i32) -> (i32, i32, i32) {
    %c0_i32 = arith.constant 0 : i32
    %c0_i32_0 = arith.constant 0 : i32
    %c0_i32_1 = arith.constant 0 : i32
    return %arg0, %c0_i32, %c0_i32_0 : i32, i32, i32
  }
  func.func @transform_6(%arg0: i32, %arg1: i32) -> (i32, i32, i32) {
    %c0_i32 = arith.constant 0 : i32
    %c0_i32_0 = arith.constant 0 : i32
    %c0_i32_1 = arith.constant 0 : i32
    return %arg0, %c0_i32, %c0_i32_0 : i32, i32, i32
  }
  func.func @transform_7(%arg0: i32, %arg1: i32) -> (i32, i32, i32) {
    %c0_i32 = arith.constant 0 : i32
    %c0_i32_0 = arith.constant 0 : i32
    %c0_i32_1 = arith.constant 0 : i32
    return %arg0, %c0_i32, %c0_i32_0 : i32, i32, i32
  }
  func.func @transform_8(%arg0: i32, %arg1: i32) -> (i32, i32, i32) {
    %c0_i32 = arith.constant 0 : i32
    %c0_i32_0 = arith.constant 0 : i32
    %c0_i32_1 = arith.constant 0 : i32
    return %arg0, %c0_i32, %c0_i32_0 : i32, i32, i32
  }
  func.func @transform_9(%arg0: i32, %arg1: i32) -> (i32, i32, i32) {
    %c0_i32 = arith.constant 0 : i32
    %c0_i32_0 = arith.constant 0 : i32
    %c0_i32_1 = arith.constant 0 : i32
    return %arg0, %c0_i32, %c0_i32_0 : i32, i32, i32
  }
  func.func @transform_10(%arg0: i32, %arg1: i32) -> (i32, i32, i32) {
    %c0_i32 = arith.constant 0 : i32
    %c0_i32_0 = arith.constant 0 : i32
    %c0_i32_1 = arith.constant 0 : i32
    return %arg0, %c0_i32, %c0_i32_0 : i32, i32, i32
  }
  func.func @transform_11(%arg0: i32, %arg1: i32) -> (i32, i32, i32) {
    %c0_i32 = arith.constant 0 : i32
    %c0_i32_0 = arith.constant 0 : i32
    %c0_i32_1 = arith.constant 0 : i32
    return %arg0, %c0_i32, %c0_i32_0 : i32, i32, i32
  }
  func.func @transform_12(%arg0: i32, %arg1: i32) -> (i32, i32, i32) {
    %c0_i32 = arith.constant 0 : i32
    %c0_i32_0 = arith.constant 0 : i32
    %c0_i32_1 = arith.constant 0 : i32
    return %arg0, %c0_i32, %c0_i32_0 : i32, i32, i32
  }
  func.func @transform_13(%arg0: i32, %arg1: i32) -> (i32, i32, i32) {
    %c0_i32 = arith.constant 0 : i32
    %c0_i32_0 = arith.constant 0 : i32
    %c0_i32_1 = arith.constant 0 : i32
    return %arg1, %c0_i32, %c0_i32_0 : i32, i32, i32
  }
}

module attributes {stable_mosaic.version = 11 : i64} {
  func.func @_cls_head_kernel(%arg0: memref<8x32xbf16, #tpu.memory_space<vmem>>, %arg1: memref<1x32xf32, #tpu.memory_space<vmem>>, %arg2: memref<1x32xf32, #tpu.memory_space<vmem>>, %arg3: memref<32x16xbf16, #tpu.memory_space<vmem>>, %arg4: memref<2x16xf32, #tpu.memory_space<vmem>>) attributes {dimension_semantics = [], scalar_prefetch = 0 : i64, scratch_operands = 0 : i64, tpu.core_type = #tpu.core_type<tc>} {
    %c0 = arith.constant 0 : index
    %c0_0 = arith.constant 0 : index
    %0 = vector.load %arg0[%c0, %c0_0] : memref<8x32xbf16, #tpu.memory_space<vmem>>, vector<8x32xbf16>
    %1 = arith.extf %0 : vector<8x32xbf16> to vector<8x32xf32>
    %c0_1 = arith.constant 0 : index
    %c0_2 = arith.constant 0 : index
    %2 = vector.load %arg1[%c0_1, %c0_2] : memref<1x32xf32, #tpu.memory_space<vmem>>, vector<1x32xf32>
    %c0_3 = arith.constant 0 : index
    %c0_4 = arith.constant 0 : index
    %3 = vector.load %arg2[%c0_3, %c0_4] : memref<1x32xf32, #tpu.memory_space<vmem>>, vector<1x32xf32>
    %cst = arith.constant dense<0.000000e+00> : vector<8xf32>
    %4 = vector.multi_reduction <add>, %1, %cst [1] : vector<8x32xf32> to vector<8xf32>
    %5 = vector.shape_cast %4 : vector<8xf32> to vector<8x1xf32>
    %cst_5 = arith.constant 3.200000e+01 : f32
    %6 = vector.broadcast %cst_5 : f32 to vector<8x1xf32>
    %7 = arith.divf %5, %6 : vector<8x1xf32>
    %8 = vector.broadcast %7 : vector<8x1xf32> to vector<8x32xf32>
    %9 = arith.subf %1, %8 : vector<8x32xf32>
    %10 = arith.mulf %9, %9 : vector<8x32xf32>
    %cst_6 = arith.constant dense<0.000000e+00> : vector<8xf32>
    %11 = vector.multi_reduction <add>, %10, %cst_6 [1] : vector<8x32xf32> to vector<8xf32>
    %12 = vector.shape_cast %11 : vector<8xf32> to vector<8x1xf32>
    %cst_7 = arith.constant 3.200000e+01 : f32
    %13 = vector.broadcast %cst_7 : f32 to vector<8x1xf32>
    %14 = arith.divf %12, %13 : vector<8x1xf32>
    %cst_8 = arith.constant 9.99999974E-6 : f32
    %15 = vector.broadcast %cst_8 : f32 to vector<8x1xf32>
    %16 = arith.addf %14, %15 : vector<8x1xf32>
    %17 = math.rsqrt %16 : vector<8x1xf32>
    %18 = vector.broadcast %17 : vector<8x1xf32> to vector<8x32xf32>
    %19 = arith.mulf %9, %18 : vector<8x32xf32>
    %20 = vector.broadcast %2 : vector<1x32xf32> to vector<8x32xf32>
    %21 = arith.mulf %19, %20 : vector<8x32xf32>
    %22 = vector.broadcast %3 : vector<1x32xf32> to vector<8x32xf32>
    %23 = arith.addf %21, %22 : vector<8x32xf32>
    %24 = arith.truncf %23 : vector<8x32xf32> to vector<8x32xbf16>
    %c0_9 = arith.constant 0 : index
    %c0_10 = arith.constant 0 : index
    %25 = vector.load %arg3[%c0_9, %c0_10] : memref<32x16xbf16, #tpu.memory_space<vmem>>, vector<32x16xbf16>
    %cst_11 = arith.constant dense<0.000000e+00> : vector<8x16xf32>
    %26 = tpu.matmul %24, %25, %cst_11 {dimension_numbers = #tpu.dot_dimension_numbers<[1], [0], [0], [1], [0, 0, 1, 1], [], []>} : vector<8x32xbf16>, vector<32x16xbf16>, vector<8x16xf32> -> vector<8x16xf32>
    %27 = vector.shape_cast %26 : vector<8x16xf32> to vector<2x4x16xf32>
    %cst_12 = arith.constant dense<0.000000e+00> : vector<2x16xf32>
    %28 = vector.multi_reduction <add>, %27, %cst_12 [1] : vector<2x4x16xf32> to vector<2x16xf32>
    %cst_13 = arith.constant 4.000000e+00 : f32
    %29 = vector.broadcast %cst_13 : f32 to vector<2x16xf32>
    %30 = arith.divf %28, %29 : vector<2x16xf32>
    %c0_14 = arith.constant 0 : index
    %c0_15 = arith.constant 0 : index
    %31 = vector.load %arg4[%c0_14, %c0_15] : memref<2x16xf32, #tpu.memory_space<vmem>>, vector<2x16xf32>
    tpu.vector_store %arg4[%c0_14, %c0_15], %30 {strides = array<i32>} : memref<2x16xf32, #tpu.memory_space<vmem>>, vector<2x16xf32>,
    return
  }
}

</mosaic_0001>

<bundles_post_ra>
// kernel: clip_visual_encoder_forward.3
= control target key start
LH: loop header
LB: loop body
LE: loop exit
PB: predicated region body
PF: predicated region fallthrough
CT: control target
= control target key end

     0   :  { %s589_s21 = smov 0   ;;  %s644_s0 = inlined_call_operand.vmem [shape: bf16[8,16,48], index: 0, kind: input, shape index: {}]   ;;  %s645_s1 = inlined_call_operand.vmem [shape: bf16[48,32], index: 1, kind: input, shape index: {}]   ;;  %s646_s2 = inlined_call_operand.vmem [shape: f32[1,32], index: 2, kind: input, shape index: {}]   ;;  %s647_s3 = inlined_call_operand.vmem [shape: f32[17,32], index: 3, kind: input, shape index: {}]   ;;  %s648_s4 = inlined_call_operand.vmem [shape: f32[1,32], index: 4, kind: input, shape index: {}]   ;;  %s649_s5 = inlined_call_operand.vmem [shape: f32[1,32], index: 5, kind: input, shape index: {}]   ;;  %s650_s6 = inlined_call_operand.vmem [shape: bf16[8,17,32], index: 6, kind: output, shape index: {}]  }
   0x1 LB: > { %s485_s22 = sadd.s32 4294967295, %s550_s21   ;;  %p489_p0 = scmp.ge.s32.totalorder %s550_s21, 1  ;;  %s550_s21 = sphi %s589_s21, %s16_s21  }
   0x2   : > { %p212_p1 = scmp.lt.s32.totalorder %s550_s21, 9 }
   0x4   : > { %p213_p2 = pnand %p489_p0, %p212_p1 }
   0x5   : > { %v534_v0 = vld [vmem:[%s645_s1] sm:$0xff] (!%p213_p2)   ;;  %v552_v1 = vmov (!%p213_p2), 0.0   ;;  %v535_v2 = vld [vmem:[%s645_s1 + $0x8] sm:$0xff] (!%p213_p2)   ;;  %vm553_vm0 = vmmov (!%p213_p2), 0   ;;  %p242_p3 = scmp.lt.s32.totalorder (!%p213_p2), %s485_s22, 7  ;;  %v536_v3 = vld [vmem:[%s645_s1 + $0x10] sm:$0xff] (!%p213_p2)  }
   0x6   : > { %216 = sbr.rel (%p213_p2) target bundleno = 557 (0x22d), region = 44  ;;  %513 = vmatprep.subr.bf16.mxu0 (!%p213_p2), %v552_v1  ;;  %519 = vmatprep.mubr.msk.bf16.mxu0 (!%p213_p2), %vm553_vm0, %v552_v1  ;;  %vm284_vm1 = vcmask (!%p213_p2), 392192   ;;  %vm332_vm2 = vcmask (!%p213_p2), 1040384   ;;  %v329_v8 = vld [vmem:[%s646_s2] sm:$0x1] (!%p213_p2)  ;;  %v341_v13 = vld [vmem:[%s647_s3 + $0x8] sm:$0xff] (!%p213_p2) }
   0x7   : > { %514 = vmatpush3.bf16.msra.mxu0 (!%p213_p2), %v534_v0  ;;  %v342_v10 = vld [vmem:[%s647_s3 + $0x10] sm:$0x1] (!%p213_p2)  ;;  %vm355_vm3 = vcmask (!%p213_p2), 253952   ;;  %v340_v15 = vld [vmem:[%s647_s3] sm:$0xff] (!%p213_p2)  ;;  %vm348_vm4 = vcmask (!%p213_p2), 261120   ;;  %vm421_vm7 = vcmask (!%p213_p2), 257024  }
   0x8   : > { %515 = vmatprep.subr.bf16.mxu0 (!%p213_p2), %v552_v1  ;;  %v498_v48 = vld [vmem:[%s648_s4] ss:$0 sm:$0xff] (!%p213_p2)  ;;  %vm425_vm5 = vsmask.f32 (!%p213_p2), 256 }
   0x9   : > { %v499_v50 = vld [vmem:[%s649_s5] ss:$0 sm:$0xff] (!%p213_p2)  ;;  %vm426_vm6 = vmand (!%p213_p2), %vm355_vm3, %vm425_vm5 }
   0xb   : > { %516 = vmatpush3.bf16.msra.mxu0 (!%p213_p2), %v535_v2 }
   0xc   : > { %517 = vmatprep.subr.bf16.mxu0 (!%p213_p2), %v552_v1 }
   0xd   : > { %s652_s22 = smov (!%p242_p3, %s485_s22), 7 }
   0xe   : > { %s505_s29 = sshll.u32 %s652_s22, 3  ;;  %s523_s17 = smul.u32 12, %s652_s22 }
   0xf   : > { %s246_s8 = scalar_lea.vmem %s644_s0, %s505_s29  ;;  %518 = vmatpush3.bf16.msra.mxu0 %v536_v3 }
  0x10   : > { %v537_v4 = vld [vmem:[%s246_s8] sm:$0xff]   ;;  %s251_s26 = scalar_lea.vmem %s650_s6, %s523_s17 }
  0x11   : > { %v427_v56 = vld [vmem:[%s251_s26 + $0x8] sm:$0x1] }
  0x12   : > { %520 = vmatmul.mubr.msk.bf16.vlgmr.msra.gmra.mrb[0].mxu0 %vm284_vm1, %v537_v4 }
  0xe5   : > { %v322_v5 = vpop.f32.mrb[0].mxu0 }
  0xe6   : > { %v333_v6 = vrot.slane %v322_v5, 7  ;;  %v521_v7 = vpop.f32.mrb[1].mxu0 }
  0xe7   : > { %v325_v9 = vpop.f32.mrb[2].mxu0 }
  0xe8   : > { %v334_v11 = vrot.slane %v325_v9, 7  ;;  %v522_v12 = vpop.f32.mrb[3].mxu0  ;;  %v339_v14 = vsel %vm332_vm2, %v329_v8, %v333_v6 }
  0xe9   : > { %v343_v20 = vadd.f32 %v340_v15, %v339_v14 }
  0xea   : > { %v345_v16 = vadd.f32 %v342_v10, %v334_v11  ;;  %v335_v17 = vsel %vm332_vm2, %v333_v6, %v334_v11 }
  0xeb   : > { %v344_v18 = vadd.f32 %v341_v13, %v335_v17  ;;  %v349_v22 = vsel %vm348_vm4, %v343_v20, 0.0 }
  0xec   : > { %v356_v19 = vsel %vm355_vm3, %v345_v16, 0.0 }
  0xed   : > { %357 = vadd.xlane.f32.xlu0 %v356_v19  ;;  %v352_v21 = vsel %vm348_vm4, %v344_v18, 0.0 }
  0xee   : > { %353 = vadd.xlane.f32.xlu1 %v352_v21 }
  0xf1   : > { %350 = vadd.xlane.f32.xlu0 %v349_v22 }
 0x17a   : > { %v358_v23 = vpop.xlane.xlu0 %357 }
 0x17b   : > { %v362_v24 = vmul.f32 0.03125, %v358_v23  ;;  %v354_v25 = vpop.xlane.xlu1 %353 }
 0x17c   : > { %v361_v26 = vmul.f32 0.03125, %v354_v25 }
 0x17d   : > { %v365_v27 = vsub.f32 %v345_v16, %v362_v24 }
 0x17e   : > { %v364_v28 = vsub.f32 %v344_v18, %v361_v26  ;;  %v351_v29 = vpop.xlane.xlu0 %350 }
 0x17f   : > { %v360_v30 = vmul.f32 0.03125, %v351_v29  ;;  %v368_v31 = vmul.f32 %v365_v27, %v365_v27 }
 0x180   : > { %v367_v34 = vmul.f32 %v364_v28, %v364_v28 }
 0x181   : > { %v363_v32 = vsub.f32 %v343_v20, %v360_v30  ;;  %v375_v33 = vsel %vm355_vm3, %v368_v31, 0.0 }
 0x182   : > { %376 = vadd.xlane.f32.xlu1 %v375_v33  ;;  %v372_v37 = vsel %vm348_vm4, %v367_v34, 0.0 }
 0x183   : > { %v366_v35 = vmul.f32 %v363_v32, %v363_v32 }
 0x185   : > { %v369_v36 = vsel %vm348_vm4, %v366_v35, 0.0 }
 0x186   : > { %370 = vadd.xlane.f32.xlu0 %v369_v36  ;;  %373 = vadd.xlane.f32.xlu1 %v372_v37 }
 0x20f   : > { %v377_v38 = vpop.xlane.xlu1 %376 }
 0x210   : > { %v380_v39 = vmul.f32 0.03125, %v377_v38 }
 0x212   : > { %v383_v40 = vadd.f32 1e-05, %v380_v39 }
 0x213   : > { %v371_v41 = vpop.xlane.xlu0 %370  ;;  %v374_v42 = vpop.xlane.xlu1 %373 }
 0x214   : > { %538 = vrsqrt.f32 %v383_v40  ;;  %v378_v43 = vmul.f32 0.03125, %v371_v41  ;;  %v379_v44 = vmul.f32 0.03125, %v374_v42 }
 0x216   : > { %v381_v45 = vadd.f32 1e-05, %v378_v43  ;;  %v382_v46 = vadd.f32 1e-05, %v379_v44 }
 0x218   : > { %540 = vrsqrt.f32 %v381_v45 }
 0x219   : > { %542 = vrsqrt.f32 %v382_v46 }
 0x21e   : > { %v539_v47 = vpop.eup %538 }
 0x21f   : > { %v389_v49 = vmul.f32 %v539_v47, %v365_v27 }
 0x221   : > { %v398_v51 = vmul.f32 %v498_v48, %v389_v49 }
 0x222   : > { %v541_v52 = vpop.eup %540 }
 0x223   : > { %v543_v53 = vpop.eup %542  ;;  %v407_v54 = vadd.f32 %v499_v50, %v398_v51  ;;  %v387_v55 = vmul.f32 %v541_v52, %v363_v32 }
 0x224   : > { %v388_v57 = vmul.f32 %v543_v53, %v364_v28 }
 0x225   : > { %v508_v58 = vpack.c.bf16 %v407_v54, %v407_v54  ;;  %v396_v59 = vmul.f32 %v498_v48, %v387_v55 }
 0x226   : > { %v397_v60 = vmul.f32 %v498_v48, %v388_v57 }
 0x227   : > { %v428_v61 = vsel %vm426_vm6, %v508_v58, %v427_v56  ;;  %v405_v62 = vadd.f32 %v499_v50, %v396_v59 }
 0x228   : > { %429 = vst [vmem:[%s251_s26 + $0x8] sm:$0x1] %v428_v61  ;;  %v406_v63 = vadd.f32 %v499_v50, %v397_v60 }
 0x229   : > { %v506_v0 = vpack.c.bf16 %v405_v62, %v405_v62 }
 0x22a   : > { %v507_v1 = vpack.c.bf16 %v406_v63, %v406_v63 }
 0x22b   : > { %422 = vst.msk [vmem:[%s251_s26] sm:$0xf] %vm421_vm7, %v506_v0 }
 0x22c   : > { %423 = vst.msk [vmem:[%s251_s26 + $0x4] sm:$0xf] %vm421_vm7, %v507_v1 }
 0x22d PF: > { %s16_s21 = sadd.s32 1, %s550_s21  }
 0x22e   : > { %p13_p4 = scmp.ge.s32.totalorder %s16_s21, 10  }
 0x230   :  { %15 = sbr.rel (!%p13_p4) target bundleno = 1 (0x1), region = 74 }

// kernel: clip_visual_encoder_forward.4
= control target key start
LH: loop header
LB: loop body
LE: loop exit
PB: predicated region body
PF: predicated region fallthrough
CT: control target
= control target key end

     0   :  { %s2651_s25 = smov 0   ;;  %s2653_s26 = smov 0   ;;  %s2996_s0 = inlined_call_operand.vmem [shape: bf16[8,17,32], index: 0, kind: input, shape index: {}, may-alias: {0,13}]   ;;  %s2997_s1 = inlined_call_operand.vmem [shape: f32[2,1,32], index: 1, kind: input, shape index: {}]   ;;  %s2998_s2 = inlined_call_operand.vmem [shape: f32[2,1,32], index: 2, kind: input, shape index: {}]   ;;  %s2999_s3 = inlined_call_operand.vmem [shape: bf16[2,32,96], index: 3, kind: input, shape index: {}]   ;;  %s3000_s4 = inlined_call_operand.vmem [shape: f32[2,1,96], index: 4, kind: input, shape index: {}]   ;;  %s3001_s5 = inlined_call_operand.vmem [shape: bf16[2,32,32], index: 5, kind: input, shape index: {}]   ;;  %s3002_s6 = inlined_call_operand.vmem [shape: f32[2,1,32], index: 6, kind: input, shape index: {}]   ;;  %s3003_s7 = inlined_call_operand.vmem [shape: f32[2,1,32], index: 7, kind: input, shape index: {}]   ;;  %s3004_s8 = inlined_call_operand.vmem [shape: f32[2,1,32], index: 8, kind: input, shape index: {}]   ;;  %s3005_s9 = inlined_call_operand.vmem [shape: bf16[2,32,128], index: 9, kind: input, shape index: {}]   ;;  %s3006_s10 = inlined_call_operand.vmem [shape: f32[2,1,128], index: 10, kind: input, shape index: {}]   ;;  %s3007_s11 = inlined_call_operand.vmem [shape: bf16[2,128,32], index: 11, kind: input, shape index: {}]   ;;  %s3008_s12 = inlined_call_operand.vmem [shape: f32[2,1,32], index: 12, kind: input, shape index: {}]   ;;  %s3009_s13 = inlined_call_operand.vmem [shape: bf16[8,17,32], index: 13, kind: output, shape index: {}, may-alias: {0,13}]  }
   0x1   :  { %s2655_s27 = smov 0   ;;  %s2657_s28 = smov 0  }
   0x2   :  { %s2659_s29 = smov 0  }
   0x3 LB: > { %s32_s30 = sadd.s32 1, %s2559_s27  ;;  %s35_s14 = sadd.s32 1, %s2563_s28  ;;  %s2567_s29 = sphi %s2659_s29, %s23_s29   ;;  %s2563_s28 = sphi %s2657_s28, %s3015_s28   ;;  %s2559_s27 = sphi %s2655_s27, %s3014_s27   ;;  %s2555_s26 = sphi %s2653_s26, %s3013_s26   ;;  %s2551_s25 = sphi %s2651_s25, %s3012_s25  }
   0x4   : > { %p33_p0 = scmp.ge.s32.totalorder %s32_s30, 8  ;;  %p2136_p1 = scmp.ge.s32.totalorder %s2567_s29, 1 }
   0x5   : > { %p503_p2 = scmp.lt.s32.totalorder %s2567_s29, 17 }
   0x6   : > { %s3017_s30 = smov (%p33_p0, %s32_s30), 0  ;;  %s3019_s14 = smov (!%p33_p0, %s35_s14), %s2563_s28 }
   0x7   : > { %p504_p3 = pnand %p2136_p1, %p503_p2  ;;  %p37_p4 = scmp.ge.s32.totalorder %s3019_s14, 2 }
   0x8   : > { %p591_p5 = scmp.lt.s32.totalorder (!%p504_p3), %s2551_s25, 7  ;;  %vm654_vm0 = vcmask (!%p504_p3), 261120   ;;  %vm661_vm1 = vcmask (!%p504_p3), 253952   ;;  %p596_p6 = scmp.lt.s32.totalorder (!%p504_p3), %s2555_s26, 1  ;;  %vm841_vm2 = vcmask (!%p504_p3), 64512   ;;  %vm848_vm3 = vcmask (!%p504_p3), 1043456  }
   0x9   : > { %s3021_s14 = smov (%p37_p4, %s3019_s14), 0  ;;  %507 = sbr.rel (%p504_p3) target bundleno = 2776 (0xad8), region = 72 }
   0xa   : > { %s2569_s24 = smov (!%p504_p3), 96   ;;  %s2571_s17 = smov (!%p504_p3), 112   ;;  %vm907_vm4 = vcmask (!%p504_p3), 131072   ;;  %vm900_vm5 = vcmask (!%p504_p3), 138240   ;;  %vm950_vm6 = vcmask (!%p504_p3), 1040384   ;;  %vm1521_vm7 = vcmask (!%p504_p3), 130048  }
   0xb   : > { %s2574_s21 = smov (!%p504_p3), 56   ;;  %vm1525_vm8 = vcmask (!%p504_p3), 195584   ;;  %vm1546_vm9 = vsmask.f32 (!%p504_p3), 256  ;;  %vm1542_vm11 = vcmask (!%p504_p3), 257024  }
   0xc   : > { %vm2901_vm10 = vmand (!%p504_p3), %vm661_vm1, %vm1546_vm9 }
  0x10   : > { %s3023_s25 = smov (!%p591_p5, %s2551_s25), 7  ;;  %s3025_s26 = smov (!%p596_p6, %s2555_s26), 1 }
  0x11   : > { %s2372_s15 = smul.u32 12, %s3023_s25  ;;  %s2714_s19 = sshll.u32 %s3025_s26, 4 }
  0x12   : > { %s606_s22 = scalar_lea.vmem %s2999_s3, %s2714_s19  ;;  %s598_s16 = scalar_lea.vmem %s2997_s1, %s3025_s26 }
  0x13   : > { %s595_s18 = scalar_lea.vmem %s2996_s0, %s2372_s15  ;;  %v2441_v23 = vld [vmem:[%s606_s22] sm:$0xff]   ;;  %v2442_v24 = vld [vmem:[%s606_s22 + $0x8] sm:$0xff]   ;;  %s601_s20 = scalar_lea.vmem %s2998_s2, %s3025_s26 }
  0x14   : > { %v2215_v0 = vld [vmem:[%s595_s18] sm:$0xff]   ;;  %v648_v1 = vld [vmem:[%s595_s18 + $0x8] sm:$0x1]  ;;  %2268 = vmatprep.subr.bf16.mxu1 %v2441_v23  ;;  %s609_s23 = scalar_lea.vmem %s3000_s4, %s3025_s26  ;;  %s2572_s18 = smov 104  }
  0x15   : > { %v2691_v2 = vunpack.c.l.bf16 %v2215_v0  ;;  %v2693_v3 = vunpack.c.l.bf16 %v648_v1  ;;  %v2695_v4 = vunpack.c.h.bf16 %v2215_v0  ;;  %2269 = vmatpush3.bf16.msra.mxu1 %v2441_v23  ;;  %v2147_v36 = vld [vmem:[%s598_s16] ss:$0 sm:$0xff]  ;;  %s2570_s16 = smov 120   ;;  %s2575_s22 = smov 48  }
  0x16   : > { %2270 = vmatprep.subr.bf16.mxu1 %v2442_v24  ;;  %v2148_v42 = vld [vmem:[%s601_s20] ss:$0 sm:$0xff]  ;;  %s2573_s20 = smov 64  }
  0x17   : > { %v655_v5 = vsel %vm654_vm0, %v2691_v2, 0.0  ;;  %v662_v6 = vsel %vm661_vm1, %v2693_v3, 0.0  ;;  %v658_v7 = vsel %vm654_vm0, %v2695_v4, 0.0  ;;  %v2149_v50 = vld [vmem:[%s609_s23] ss:$0 sm:$0xff]  ;;  %s2577_s23 = smov 40  }
  0x18   : > { %656 = vadd.xlane.f32.xlu0 %v655_v5  ;;  %663 = vadd.xlane.f32.xlu1 %v662_v6 }
  0x19   : > { %2271 = vmatpush3.bf16.msra.mxu1 %v2442_v24 }
  0x1c   : > { %659 = vadd.xlane.f32.xlu0 %v658_v7 }
  0xa5   : > { %v657_v8 = vpop.xlane.xlu0 %656  ;;  %v664_v9 = vpop.xlane.xlu1 %663 }
  0xa6   : > { %v666_v10 = vmul.f32 0.03125, %v657_v8  ;;  %v668_v11 = vmul.f32 0.03125, %v664_v9 }
  0xa8   : > { %v669_v12 = vsub.f32 %v2691_v2, %v666_v10  ;;  %v671_v13 = vsub.f32 %v2693_v3, %v668_v11 }
  0xa9   : > { %v660_v14 = vpop.xlane.xlu0 %659 }
  0xaa   : > { %v667_v15 = vmul.f32 0.03125, %v660_v14  ;;  %v672_v16 = vmul.f32 %v669_v12, %v669_v12  ;;  %v674_v17 = vmul.f32 %v671_v13, %v671_v13 }
  0xac   : > { %v670_v18 = vsub.f32 %v2695_v4, %v667_v15  ;;  %v675_v19 = vsel %vm654_vm0, %v672_v16, 0.0  ;;  %v681_v20 = vsel %vm661_vm1, %v674_v17, 0.0 }
  0xad   : > { %676 = vadd.xlane.f32.xlu1 %v675_v19 }
  0xae   : > { %v673_v21 = vmul.f32 %v670_v18, %v670_v18 }
  0xb0   : > { %v678_v22 = vsel %vm654_vm0, %v673_v21, 0.0 }
  0xb1   : > { %682 = vadd.xlane.f32.xlu1 %v681_v20  ;;  %679 = vadd.xlane.f32.xlu0 %v678_v22 }
 0x13a   : > { %v677_v25 = vpop.xlane.xlu1 %676 }
 0x13b   : > { %v684_v26 = vmul.f32 0.03125, %v677_v25 }
 0x13d   : > { %v687_v27 = vadd.f32 1e-05, %v684_v26 }
 0x13e   : > { %v683_v28 = vpop.xlane.xlu1 %682  ;;  %v680_v29 = vpop.xlane.xlu0 %679 }
 0x13f   : > { %2457 = vrsqrt.f32 %v687_v27  ;;  %v686_v30 = vmul.f32 0.03125, %v683_v28  ;;  %v685_v31 = vmul.f32 0.03125, %v680_v29 }
 0x141   : > { %v689_v32 = vadd.f32 1e-05, %v686_v30  ;;  %v688_v33 = vadd.f32 1e-05, %v685_v31 }
 0x143   : > { %2459 = vrsqrt.f32 %v689_v32 }
 0x144   : > { %2461 = vrsqrt.f32 %v688_v33 }
 0x149   : > { %v2458_v34 = vpop.eup %2457 }
 0x14a   : > { %v693_v35 = vmul.f32 %v2458_v34, %v669_v12 }
 0x14c   : > { %v702_v41 = vmul.f32 %v2147_v36, %v693_v35 }
 0x14d   : > { %v2460_v37 = vpop.eup %2459 }
 0x14e   : > { %v2462_v38 = vpop.eup %2461  ;;  %v695_v39 = vmul.f32 %v2460_v37, %v671_v13  ;;  %v711_v46 = vadd.f32 %v2148_v42, %v702_v41 }
 0x14f   : > { %v694_v40 = vmul.f32 %v2462_v38, %v670_v18 }
 0x150   : > { %v704_v43 = vmul.f32 %v2147_v36, %v695_v39 }
 0x151   : > { %v703_v44 = vmul.f32 %v2147_v36, %v694_v40 }
 0x152   : > { %v713_v45 = vadd.f32 %v2148_v42, %v704_v43 }
 0x153   : > { %v712_v47 = vadd.f32 %v2148_v42, %v703_v44 }
 0x154   : > { %v715_v48 = vpack.c.bf16 %v713_v45, %v713_v45 }
 0x155   : > { %v714_v49 = vpack.c.bf16 %v712_v47, %v711_v46 }
 0x157   : > { %2272 = vmatprep.mubr.msk.bf16.mxu1 %vm654_vm0, %v714_v49 }
 0x158   : > { %2273 = vmatmul.mubr.msk.bf16.vlgmr.msra.gmra.mrb[0].mxu1 %vm654_vm0, %v715_v48 }
 0x22b   : > { %v2274_v51 = vpop.f32.mrb[0].mxu1 }
 0x22c   : > { %v779_v52 = vpop.f32.mrb[1].mxu1  ;;  %v788_v53 = vadd.f32 %v2274_v51, %v2149_v50 }
 0x22d   : > { %v780_v54 = vadd.f32 %v2149_v50, %v779_v52  ;;  %v2275_v55 = vpop.f32.mrb[2].mxu1 }
 0x22e   : > { %v782_v56 = vpop.f32.mrb[3].mxu1  ;;  %v2734_v58 = vpack.c.bf16 %v788_v53, %v788_v53 }
 0x22f   : > { %v783_v57 = vadd.f32 %v2149_v50, %v782_v56  ;;  %796 = vrot.lane.b32.xlu0 %v780_v54, %s2569_s24 }
 0x231   : > { %v2736_v59 = vpack.c.bf16 %v783_v57, %v780_v54  ;;  %798 = vrot.lane.b32.xlu1 %v783_v57, %s2569_s24 }
 0x233   : > { %1006 = vrot.lane.b32.xlu0 %v2734_v58, %s2570_s16  ;;  %2278 = vmatprep.mubr.msk.bf16.mxu1 %vm841_vm2, %v2736_v59 }
 0x235   : > { %800 = vrot.lane.b32.xlu1 %v788_v53, %s2569_s24  ;;  %s2578_s24 = smov 8  }
 0x237   : > { %1164 = vrot.lane.b32.xlu0 %v2736_v59, %s2571_s17 }
 0x239   : > { %1004 = vrot.lane.b32.xlu1 %v2736_v59, %s2570_s16  ;;  %s2579_s16 = smov 16  }
 0x23b   : > { %1166 = vrot.lane.b32.xlu0 %v2734_v58, %s2571_s17 }
 0x23f   : > { %1322 = vrot.lane.b32.xlu0 %v2736_v59, %s2572_s18 }
 0x243   : > { %1324 = vrot.lane.b32.xlu0 %v2734_v58, %s2572_s18  ;;  %s628_s18 = scalar_lea.vmem %s3005_s9, %s2714_s19 }
 0x2a1   : > { %v797_v60 = vpop.permute.xlu0 %796 }
 0x2a2   : > { %805 = vxpose.xlu1.b32.start [1/3] (short) (narrow) %v797_v60, 32 }
 0x2a3   : > { %v799_v61 = vpop.permute.xlu1 %798 }
 0x2a5   : > { %v1007_v1 = vpop.permute.xlu0 %1006 }
 0x2a6   : > { %806 = vxpose.xlu1.b32.cont [2/3] (short) (narrow) %v799_v61, 32 }
 0x2a7   : > { %v801_v62 = vpop.permute.xlu1 %800 }
 0x2a9   : > { %v1165_v10 = vpop.permute.xlu0 %1164 }
 0x2aa   : > { %807 = vxpose.xlu1.b32.end [3/3] (short) (narrow) %v801_v62, 32 }
 0x2ab   : > { %v1005_v63 = vpop.permute.xlu1 %1004 }
 0x2ac   : > { %2292 = vmatprep.mubr.msk.bf16.mxu0 %vm841_vm2, %v1005_v63 }
 0x2ad   : > { %v1167_v14 = vpop.permute.xlu0 %1166 }
 0x2b1   : > { %v1323_v18 = vpop.permute.xlu0 %1322 }
 0x2b5   : > { %v1325_v19 = vpop.permute.xlu0 %1324 }
 0x322   : > { %v821_v0 = vpop.trf.xlu1 }
 0x326   : > { %v822_v5 = vpop.trf.xlu1 }
 0x327   : > { %v837_v6 = vpack.c.bf16 %v822_v5, %v821_v0 }
 0x329   : > { %2368 = vmatprep.subr.msk.bf16.mxu1 %vm848_vm3, %v837_v6  ;;  %v850_v7 = vsel %vm848_vm3, %v837_v6, 0  ;;  %v1009_v8 = vrot.slane %v837_v6, 4 }
 0x32a   : > { %2277 = vmatpush3.bf16.msra.mxu1 %v850_v7  ;;  %v823_v9 = vpop.trf.xlu1 }
 0x32b   : > { %2369 = vmatprep.subr.msk.bf16.mxu0 %vm848_vm3, %v1009_v8  ;;  %v1017_v11 = vsel %vm848_vm3, %v1009_v8, 0 }
 0x32c   : > { %2291 = vmatpush3.bf16.msra.mxu0 %v1017_v11 }
 0x32d   : > { %2279 = vmatmul.mubr.msk.bf16.vlgmr.msra.gmra.mrb[4].mxu1 %vm841_vm2, %v2734_v58 }
 0x32e   : > { %v824_v12 = vpop.trf.xlu1 }
 0x32f   : > { %2293 = vmatmul.mubr.msk.bf16.vlgmr.msra.gmra.mrb[0].mxu0 %vm841_vm2, %v1007_v1  ;;  %v838_v13 = vpack.c.bf16 %v824_v12, %v823_v9 }
 0x330   : > { %2306 = vmatprep.mubr.msk.bf16.mxu0 %vm841_vm2, %v1165_v10 }
 0x331   : > { %v1327_v15 = vrot.slane %v838_v13, 4  ;;  %2370 = vmatprep.subr.msk.bf16.mxu0 %vm848_vm3, %v838_v13  ;;  %v1175_v16 = vsel %vm848_vm3, %v838_v13, 0 }
 0x332   : > { %2305 = vmatpush3.bf16.msra.mxu0 %v1175_v16 }
 0x333   : > { %2371 = vmatprep.subr.msk.bf16.mxu0 %vm848_vm3, %v1327_v15  ;;  %v1335_v17 = vsel %vm848_vm3, %v1327_v15, 0 }
 0x337   : > { %2307 = vmatmul.mubr.msk.bf16.vlgmr.msra.gmra.mrb[4].mxu0 %vm841_vm2, %v1167_v14 }
 0x338   : > { %2320 = vmatprep.mubr.msk.bf16.mxu0 %vm841_vm2, %v1323_v18  ;;  %2319 = vmatpush3.bf16.msra.mxu0 %v1335_v17  ;;  %v2576_v17 = vmov 0  }
 0x339   : > { %v2820_v18 = vsel %vm950_vm6, 65535, %v2576_v17 }
 0x33f   : > { %2321 = vmatmul.mubr.msk.bf16.vlgmr.msra.gmra.mrb[8].mxu0 %vm841_vm2, %v1325_v19 }
 0x400   : > { %v2280_v20 = vpop.f32.mrb[4].mxu1 }
 0x401   : > { %v886_v21 = vpop.f32.mrb[5].mxu1  ;;  %v908_v22 = vsel %vm907_vm4, %v2280_v20, -inf }
 0x402   : > { %v2294_v23 = vpop.f32.mrb[0].mxu0  ;;  %909 = vmax.xlane.f32.xlu1 %v908_v22  ;;  %v2281_v24 = vpop.f32.mrb[6].mxu1  ;;  %v901_v25 = vsel %vm900_vm5, %v886_v21, -inf }
 0x403   : > { %v2764_v26 = vpop.f32.mrb[1].mxu0  ;;  %902 = vmax.xlane.f32.xlu0 %v901_v25  ;;  %v889_v27 = vpop.f32.mrb[7].mxu1  ;;  %v1073_v30 = vsel %vm907_vm4, %v2294_v23, -inf }
 0x404   : > { %v2295_v28 = vpop.f32.mrb[2].mxu0  ;;  %v904_v32 = vsel %vm900_vm5, %v889_v27, -inf  ;;  %v1067_v36 = vsel %vm900_vm5, %v2764_v26, -inf }
 0x405   : > { %v2766_v29 = vpop.f32.mrb[3].mxu0 }
 0x406   : > { %v1070_v38 = vsel %vm900_vm5, %v2766_v29, -inf }
 0x407   : > { %1074 = vmax.xlane.f32.xlu0 %v1073_v30 }
 0x40a   : > { %v2769_v31 = vpop.f32.mrb[4].mxu0 }
 0x40b   : > { %v2772_v33 = vpop.f32.mrb[5].mxu0  ;;  %905 = vmax.xlane.f32.xlu0 %v904_v32  ;;  %v1231_v42 = vsel %vm907_vm4, %v2769_v31, -inf }
 0x40c   : > { %v2309_v34 = vpop.f32.mrb[6].mxu0  ;;  %v1225_v43 = vsel %vm900_vm5, %v2772_v33, -inf }
 0x40d   : > { %v2774_v35 = vpop.f32.mrb[7].mxu0 }
 0x40e   : > { %v1228_v44 = vsel %vm900_vm5, %v2774_v35, -inf }
 0x40f   : > { %1068 = vmax.xlane.f32.xlu0 %v1067_v36 }
 0x412   : > { %v2778_v37 = vpop.f32.mrb[8].mxu0 }
 0x413   : > { %v2782_v39 = vpop.f32.mrb[9].mxu0  ;;  %941 = vrot.lane.b32.xlu1 %v2734_v58, %s2573_s20  ;;  %1071 = vmax.xlane.f32.xlu0 %v1070_v38  ;;  %v1391_v45 = vsel %vm907_vm4, %v2778_v37, -inf }
 0x414   : > { %v2323_v40 = vpop.f32.mrb[10].mxu0  ;;  %v1385_v46 = vsel %vm900_vm5, %v2782_v39, -inf }
 0x415   : > { %v2785_v41 = vpop.f32.mrb[11].mxu0 }
 0x416   : > { %v1388_v47 = vsel %vm900_vm5, %v2785_v41, -inf }
 0x417   : > { %1102 = vrot.lane.b32.xlu1 %v2736_v59, %s2574_s21  ;;  %1232 = vmax.xlane.f32.xlu0 %v1231_v42 }
 0x41b   : > { %1226 = vmax.xlane.f32.xlu0 %v1225_v43 }
 0x41f   : > { %1229 = vmax.xlane.f32.xlu0 %v1228_v44 }
 0x423   : > { %1392 = vmax.xlane.f32.xlu0 %v1391_v45 }
 0x427   : > { %1386 = vmax.xlane.f32.xlu0 %v1385_v46 }
 0x42b   : > { %1389 = vmax.xlane.f32.xlu0 %v1388_v47 }
 0x441   : > { %939 = vrot.lane.b32.xlu0 %v2736_v59, %s2573_s20  ;;  %s614_s20 = scalar_lea.vmem %s3001_s5, %s2714_s19 }
 0x48f   : > { %v910_v48 = vpop.xlane.xlu1 %909 }
 0x490   : > { %v913_v49 = vsub.f32 %v2280_v20, %v910_v48  ;;  %v903_v50 = vpop.xlane.xlu0 %902 }
 0x491   : > { %v911_v51 = vsub.f32 %v886_v21, %v903_v50 }
 0x492   : > { %v918_v52 = vmul.f32 1.442695, %v913_v49 }
 0x493   : > { %v914_v53 = vmul.f32 1.442695, %v911_v51  ;;  %v942_v19 = vpop.permute.xlu1 %941 }
 0x494   : > { %2463 = vpow2.f32 %v918_v52  ;;  %v1075_v54 = vpop.xlane.xlu0 %1074  ;;  %v954_v21 = vand.u32 %v2820_v18, %v942_v19 }
 0x495   : > { %2465 = vpow2.f32 %v914_v53  ;;  %v1078_v55 = vsub.f32 %v2294_v23, %v1075_v54 }
 0x497   : > { %v1083_v56 = vmul.f32 1.442695, %v1078_v55  ;;  %v2825_v22 = vpop.permute.xlu1 %1102 }
 0x498   : > { %v906_v57 = vpop.xlane.xlu0 %905 }
 0x499   : > { %2467 = vpow2.f32 %v1083_v56  ;;  %v912_v60 = vsub.f32 %v889_v27, %v906_v57 }
 0x49b   : > { %v916_v61 = vmul.f32 1.442695, %v912_v60 }
 0x49c   : > { %v1069_v62 = vpop.xlane.xlu0 %1068 }
 0x49d   : > { %2469 = vpow2.f32 %v916_v61  ;;  %v1076_v27 = vsub.f32 %v2764_v26, %v1069_v62 }
 0x49e   : > { %v2802_v63 = vpop.eup %2463 }
 0x49f   : > { %v2804_v0 = vpop.eup %2465  ;;  %v926_v1 = vsel %vm907_vm4, %v2802_v63, 0.0  ;;  %v1079_v32 = vmul.f32 1.442695, %v1076_v27 }
 0x4a0   : > { %927 = vadd.xlane.f32.xlu1 %v926_v1  ;;  %v1072_v5 = vpop.xlane.xlu0 %1071  ;;  %v920_v6 = vsel %vm900_vm5, %v2804_v0, 0.0 }
 0x4a1   : > { %921 = vadd.xlane.f32.xlu0 %v920_v6  ;;  %v1077_v23 = vsub.f32 %v2766_v29, %v1072_v5 }
 0x4a3   : > { %v2810_v7 = vpop.eup %2467  ;;  %v1081_v24 = vmul.f32 1.442695, %v1077_v23 }
 0x4a4   : > { %v1233_v8 = vpop.xlane.xlu0 %1232  ;;  %v1091_v9 = vsel %vm907_vm4, %v2810_v7, 0.0 }
 0x4a5   : > { %1092 = vadd.xlane.f32.xlu0 %v1091_v9  ;;  %v1236_v25 = vsub.f32 %v2769_v31, %v1233_v8  ;;  %2471 = vpow2.f32 %v1081_v24 }
 0x4a7   : > { %v2814_v10 = vpop.eup %2469  ;;  %v1241_v28 = vmul.f32 1.442695, %v1236_v25 }
 0x4a8   : > { %v1227_v11 = vpop.xlane.xlu0 %1226  ;;  %v923_v12 = vsel %vm900_vm5, %v2814_v10, 0.0 }
 0x4a9   : > { %924 = vadd.xlane.f32.xlu0 %v923_v12  ;;  %v1234_v30 = vsub.f32 %v2772_v33, %v1227_v11  ;;  %2473 = vpow2.f32 %v1241_v28 }
 0x4aa   : > { %2475 = vpow2.f32 %v1079_v32 }
 0x4ab   : > { %v1237_v36 = vmul.f32 1.442695, %v1234_v30 }
 0x4ac   : > { %v1230_v13 = vpop.xlane.xlu0 %1229 }
 0x4ad   : > { %v1235_v34 = vsub.f32 %v2774_v35, %v1230_v13  ;;  %2477 = vpow2.f32 %v1237_v36 }
 0x4af   : > { %v1239_v29 = vmul.f32 1.442695, %v1235_v34  ;;  %v2836_v43 = vpop.eup %2471 }
 0x4b0   : > { %v1393_v14 = vpop.xlane.xlu0 %1392  ;;  %v1088_v35 = vsel %vm900_vm5, %v2836_v43, 0.0 }
 0x4b1   : > { %1260 = vrot.lane.b32.xlu1 %v2736_v59, %s2575_s22  ;;  %v1396_v40 = vsub.f32 %v2778_v37, %v1393_v14  ;;  %2479 = vpow2.f32 %v1239_v29 }
 0x4b3   : > { %v1401_v31 = vmul.f32 1.442695, %v1396_v40  ;;  %v2840_v44 = vpop.eup %2473 }
 0x4b4   : > { %v1387_v15 = vpop.xlane.xlu0 %1386  ;;  %v1249_v37 = vsel %vm907_vm4, %v2840_v44, 0.0 }
 0x4b5   : > { %1262 = vrot.lane.b32.xlu1 %v2734_v58, %s2575_s22  ;;  %v1394_v38 = vsub.f32 %v2782_v39, %v1387_v15  ;;  %v2842_v39 = vpop.eup %2475  ;;  %s631_s22 = scalar_lea.vmem %s3006_s10, %s3025_s26 }
 0x4b7   : > { %v1397_v42 = vmul.f32 1.442695, %v1394_v38  ;;  %v2846_v45 = vpop.eup %2477 }
 0x4b8   : > { %v1390_v16 = vpop.xlane.xlu0 %1389  ;;  %v1243_v47 = vsel %vm900_vm5, %v2846_v45, 0.0 }
 0x4b9   : > { %v1395_v26 = vsub.f32 %v2785_v41, %v1390_v16  ;;  %2481 = vpow2.f32 %v1397_v42  ;;  %v1085_v41 = vsel %vm900_vm5, %v2842_v39, 0.0 }
 0x4ba   : > { %2483 = vpow2.f32 %v1401_v31 }
 0x4bb   : > { %v1399_v33 = vmul.f32 1.442695, %v1395_v26  ;;  %v2850_v46 = vpop.eup %2479 }
 0x4bc   : > { %v940_v20 = vpop.permute.xlu0 %939  ;;  %v1246_v49 = vsel %vm900_vm5, %v2850_v46, 0.0 }
 0x4bd   : > { %2282 = vmatprep.subr.bf16.mxu1 %v940_v20  ;;  %2485 = vpow2.f32 %v1399_v33 }
 0x4be   : > { %2283 = vmatpush3.bf16.msra.mxu1 %v940_v20 }
 0x4bf   : > { %1104 = vrot.lane.b32.xlu0 %v2734_v58, %s2574_s21  ;;  %2284 = vmatprep.subr.bf16.mxu1 %v954_v21  ;;  %s2580_s21 = smov 24  }
 0x4c2   : > { %2285 = vmatpush3.bf16.msra.mxu1 %v954_v21 }
 0x4c3   : > { %2296 = vmatprep.subr.bf16.mxu1 %v2825_v22  ;;  %v2854_v48 = vpop.eup %2481 }
 0x4c4   : > { %v2858_v50 = vpop.eup %2483  ;;  %v1403_v51 = vsel %vm900_vm5, %v2854_v48, 0.0 }
 0x4c5   : > { %v1409_v52 = vsel %vm907_vm4, %v2858_v50, 0.0 }
 0x4c7   : > { %v2864_v53 = vpop.eup %2485 }
 0x4c8   : > { %v1406_v54 = vsel %vm900_vm5, %v2864_v53, 0.0 }
 0x4d9   : > { %1089 = vadd.xlane.f32.xlu1 %v1088_v35 }
 0x4dd   : > { %1250 = vadd.xlane.f32.xlu1 %v1249_v37 }
 0x4de   : > { %1086 = vadd.xlane.f32.xlu0 %v1085_v41 }
 0x4e1   : > { %1244 = vadd.xlane.f32.xlu1 %v1243_v47 }
 0x4e2   : > { %1247 = vadd.xlane.f32.xlu0 %v1246_v49 }
 0x4e5   : > { %1404 = vadd.xlane.f32.xlu1 %v1403_v51 }
 0x4e6   : > { %1410 = vadd.xlane.f32.xlu0 %v1409_v52 }
 0x4ea   : > { %1407 = vadd.xlane.f32.xlu0 %v1406_v54 }
 0x4f6   : > { %1420 = vrot.lane.b32.xlu1 %v2736_v59, %s2577_s23 }
 0x500   : > { %1422 = vrot.lane.b32.xlu0 %v2734_v58, %s2577_s23 }
 0x52d   : > { %v928_v56 = vpop.xlane.xlu1 %927 }
 0x52e   : > { %v922_v55 = vpop.xlane.xlu0 %921  ;;  %2487 = vrcp.f32 %v928_v56 }
 0x52f   : > { %2489 = vrcp.f32 %v922_v55 }
 0x531   : > { %v1261_v12 = vpop.permute.xlu1 %1260 }
 0x532   : > { %v1093_v57 = vpop.xlane.xlu0 %1092 }
 0x536   : > { %v925_v60 = vpop.xlane.xlu0 %924 }
 0x537   : > { %2491 = vrcp.f32 %v925_v60 }
 0x538   : > { %v2488_v61 = vpop.eup %2487  ;;  %2493 = vrcp.f32 %v1093_v57 }
 0x539   : > { %v2490_v62 = vpop.eup %2489  ;;  %v934_v5 = vmul.f32 %v2488_v61, %v2802_v63  ;;  %v1263_v63 = vpop.permute.xlu1 %1262 }
 0x53a   : > { %v932_v6 = vmul.f32 %v2490_v62, %v2804_v0  ;;  %v1105_v9 = vpop.permute.xlu0 %1104  ;;  %v2443_v62 = vld [vmem:[%s614_s20] sm:$0xff]  }
 0x53b   : > { %v936_v11 = vpack.c.bf16 %v934_v5, %v934_v5  ;;  %v1114_v58 = vand.u32 %v1105_v9, %v2820_v18  ;;  %v2444_v5 = vld [vmem:[%s614_s20 + $0x8] sm:$0xff]   ;;  %2332 = vmatprep.subr.bf16.mxu0 %v2443_v62 }
 0x53c   : > { %2333 = vmatpush3.bf16.msra.mxu0 %v2443_v62 }
 0x53d   : > { %2334 = vmatprep.subr.bf16.mxu0 %v2444_v5 }
 0x540   : > { %2335 = vmatpush3.bf16.msra.mxu0 %v2444_v5  ;;  %v2448_v5 = vld [vmem:[%s628_s18 + $0x8] sm:$0xff]  }
 0x541   : > { %v2492_v1 = vpop.eup %2491 }
 0x542   : > { %v933_v8 = vmul.f32 %v2492_v1, %v2814_v10  ;;  %v2494_v16 = vpop.eup %2493 }
 0x544   : > { %v935_v59 = vpack.c.bf16 %v933_v8, %v932_v6 }
 0x546   : > { %2286 = vmatprep.mubr.msk.bf16.mxu1 %vm900_vm5, %v935_v59 }
 0x547   : > { %2287 = vmatmul.mubr.msk.bf16.vlgmr.msra.gmra.mrb[8].mxu1 %vm900_vm5, %v936_v11 }
 0x548   : > { %2297 = vmatpush3.bf16.msra.mxu1 %v2825_v22  ;;  %v1099_v22 = vmul.f32 %v2494_v16, %v2810_v7  ;;  %v1272_v7 = vand.u32 %v1263_v63, %v2820_v18 }
 0x549   : > { %2298 = vmatprep.subr.bf16.mxu1 %v1114_v58 }
 0x54a   : > { %v1101_v32 = vpack.c.bf16 %v1099_v22, %v1099_v22 }
 0x54c   : > { %2299 = vmatpush3.bf16.msra.mxu1 %v1114_v58 }
 0x54d   : > { %2310 = vmatprep.subr.bf16.mxu1 %v1261_v12 }
 0x566   : > { %v1090_v13 = vpop.xlane.xlu1 %1089 }
 0x567   : > { %2495 = vrcp.f32 %v1090_v13 }
 0x56a   : > { %v1251_v0 = vpop.xlane.xlu1 %1250 }
 0x56b   : > { %v1087_v10 = vpop.xlane.xlu0 %1086 }
 0x56c   : > { %2497 = vrcp.f32 %v1087_v10 }
 0x56e   : > { %v1245_v14 = vpop.xlane.xlu1 %1244 }
 0x56f   : > { %2499 = vrcp.f32 %v1245_v14  ;;  %v1248_v15 = vpop.xlane.xlu0 %1247 }
 0x570   : > { %2501 = vrcp.f32 %v1248_v15  ;;  %v1548_v15 = vld [vmem:[#allocation2 + $0x8] sm:$0x1] }
 0x571   : > { %2503 = vrcp.f32 %v1251_v0  ;;  %v2496_v20 = vpop.eup %2495 }
 0x572   : > { %v1405_v17 = vpop.xlane.xlu1 %1404  ;;  %v1098_v25 = vmul.f32 %v2496_v20, %v2836_v43 }
 0x573   : > { %v1411_v19 = vpop.xlane.xlu0 %1410  ;;  %2505 = vrcp.f32 %v1405_v17 }
 0x576   : > { %v2498_v21 = vpop.eup %2497  ;;  %v1421_v31 = vpop.permute.xlu1 %1420 }
 0x577   : > { %v1408_v23 = vpop.xlane.xlu0 %1407  ;;  %v1097_v24 = vmul.f32 %v2498_v21, %v2842_v39 }
 0x578   : > { %2507 = vrcp.f32 %v1408_v23 }
 0x579   : > { %v2500_v27 = vpop.eup %2499  ;;  %2509 = vrcp.f32 %v1411_v19  ;;  %v1100_v28 = vpack.c.bf16 %v1098_v25, %v1097_v24 }
 0x57a   : > { %v2502_v30 = vpop.eup %2501  ;;  %v1255_v34 = vmul.f32 %v2500_v27, %v2846_v45 }
 0x57b   : > { %v2504_v36 = vpop.eup %2503  ;;  %2300 = vmatprep.mubr.msk.bf16.mxu1 %vm900_vm5, %v1100_v28  ;;  %v1256_v38 = vmul.f32 %v2502_v30, %v2850_v46  ;;  %v1423_v26 = vpop.permute.xlu0 %1422 }
 0x57c   : > { %2301 = vmatmul.mubr.msk.bf16.vlgmr.msra.gmra.mrb[12].mxu1 %vm900_vm5, %v1101_v32  ;;  %v1257_v40 = vmul.f32 %v2504_v36, %v2840_v44  ;;  %v1432_v45 = vand.u32 %v1423_v26, %v2820_v18 }
 0x57d   : > { %2311 = vmatpush3.bf16.msra.mxu1 %v1261_v12  ;;  %v1258_v29 = vpack.c.bf16 %v1256_v38, %v1255_v34  ;;  %v2506_v42 = vpop.eup %2505 }
 0x57e   : > { %2312 = vmatprep.subr.bf16.mxu1 %v1272_v7  ;;  %v1259_v33 = vpack.c.bf16 %v1257_v40, %v1257_v40  ;;  %v1415_v39 = vmul.f32 %v2506_v42, %v2854_v48 }
 0x57f   : > { %2314 = vmatprep.mubr.msk.bf16.mxu1 %vm900_vm5, %v1258_v29 }
 0x581   : > { %2313 = vmatpush3.bf16.msra.mxu1 %v1272_v7 }
 0x582   : > { %v2508_v43 = vpop.eup %2507  ;;  %2324 = vmatprep.subr.bf16.mxu1 %v1421_v31 }
 0x583   : > { %v2510_v35 = vpop.eup %2509  ;;  %v1416_v37 = vmul.f32 %v2508_v43, %v2864_v53 }
 0x584   : > { %2315 = vmatmul.mubr.msk.bf16.vlgmr.msra.gmra.mrb[16].mxu1 %vm900_vm5, %v1259_v33  ;;  %v1417_v41 = vmul.f32 %v2510_v35, %v2858_v50 }
 0x585   : > { %2325 = vmatpush3.bf16.msra.mxu1 %v1421_v31  ;;  %v1418_v44 = vpack.c.bf16 %v1416_v37, %v1415_v39 }
 0x586   : > { %2326 = vmatprep.subr.bf16.mxu1 %v1432_v45  ;;  %v1419_v46 = vpack.c.bf16 %v1417_v41, %v1417_v41 }
 0x587   : > { %2328 = vmatprep.mubr.msk.bf16.mxu1 %vm900_vm5, %v1418_v44 }
 0x589   : > { %2327 = vmatpush3.bf16.msra.mxu1 %v1432_v45 }
 0x58c   : > { %2329 = vmatmul.mubr.msk.bf16.vlgmr.msra.gmra.mrb[20].mxu1 %vm900_vm5, %v1419_v46 }
 0x61a   : > { %v2288_v47 = vpop.f32.mrb[8].mxu1 }
 0x61b   : > { %v990_v49 = vpop.f32.mrb[9].mxu1 }
 0x61c   : > { %v2289_v48 = vpop.f32.mrb[10].mxu1 }
 0x61d   : > { %v993_v51 = vpop.f32.mrb[11].mxu1 }
 0x64f   : > { %v2302_v52 = vpop.f32.mrb[12].mxu1 }
 0x650   : > { %1489 = vrot.lane.b32.xlu0 %v2302_v52, %s2578_s24  ;;  %v1150_v18 = vpop.f32.mrb[13].mxu1 }
 0x651   : > { %v2303_v53 = vpop.f32.mrb[14].mxu1 }
 0x652   : > { %v1153_v54 = vpop.f32.mrb[15].mxu1 }
 0x653   : > { %v2426_v55 = vpack.i.bf16 %v1153_v54, %v1150_v18 }
 0x655   : > { %2427 = vrot.lane.b32.xlu1 %v2426_v55, %s2578_s24  ;;  %s617_s24 = scalar_lea.vmem %s3002_s6, %s3025_s26 }
 0x656   : > { %v2173_v31 = vld [vmem:[%s617_s24] ss:$0 sm:$0xff]  ;;  %s623_s24 = scalar_lea.vmem %s3004_s8, %s3025_s26 }
 0x657   : > { %v2316_v50 = vpop.f32.mrb[16].mxu1 }
 0x658   : > { %1501 = vrot.lane.b32.xlu0 %v2316_v50, %s2579_s16  ;;  %v1308_v56 = vpop.f32.mrb[17].mxu1 }
 0x659   : > { %v2317_v57 = vpop.f32.mrb[18].mxu1 }
 0x65a   : > { %v1311_v60 = vpop.f32.mrb[19].mxu1 }
 0x65b   : > { %v2431_v61 = vpack.i.bf16 %v1311_v60, %v1308_v56 }
 0x65d   : > { %2432 = vrot.lane.b32.xlu1 %v2431_v61, %s2579_s16  ;;  %s2207_s16 = sshll.u32 %s3025_s26, 6 }
 0x65e   : > { %s636_s19 = scalar_lea.vmem %s3007_s11, %s2207_s16  ;;  %s639_s16 = scalar_lea.vmem %s3008_s12, %s3025_s26 }
 0x65f   : > { %v2330_v1 = vpop.f32.mrb[20].mxu1 }
 0x660   : > { %1513 = vrot.lane.b32.xlu0 %v2330_v1, %s2580_s21  ;;  %v1468_v6 = vpop.f32.mrb[21].mxu1  ;;  %v2447_v1 = vld [vmem:[%s628_s18] sm:$0xff]  }
 0x661   : > { %v2331_v8 = vpop.f32.mrb[22].mxu1  ;;  %2340 = vmatprep.subr.bf16.mxu1 %v2447_v1 }
 0x662   : > { %v1471_v9 = vpop.f32.mrb[23].mxu1  ;;  %2341 = vmatpush3.bf16.msra.mxu1 %v2447_v1 }
 0x663   : > { %v2436_v59 = vpack.i.bf16 %v1471_v9, %v1468_v6  ;;  %2342 = vmatprep.subr.bf16.mxu1 %v2448_v5 }
 0x665   : > { %2437 = vrot.lane.b32.xlu1 %v2436_v59, %s2580_s21  ;;  %s620_s21 = scalar_lea.vmem %s3003_s7, %s3025_s26 }
 0x666   : > { %2343 = vmatpush3.bf16.msra.mxu1 %v2448_v5 }
 0x6c2   : > { %v1490_v11 = vpop.permute.xlu0 %1489 }
 0x6c3   : > { %v1520_v63 = vsel %vm841_vm2, %v2288_v47, %v1490_v11 }
 0x6c7   : > { %v2428_v58 = vpop.permute.xlu1 %2427 }
 0x6c8   : > { %v2430_v17 = vunpack.i.h.bf16 %v2428_v58  ;;  %v2429_v19 = vunpack.i.l.bf16 %v2428_v58 }
 0x6ca   : > { %v1502_v12 = vpop.permute.xlu0 %1501  ;;  %v1519_v25 = vsel %vm841_vm2, %v993_v51, %v2430_v17  ;;  %v1518_v27 = vsel %vm841_vm2, %v990_v49, %v2429_v19 }
 0x6cb   : > { %v1524_v13 = vsel %vm1521_vm7, %v1520_v63, %v1502_v12 }
 0x6cf   : > { %v2433_v0 = vpop.permute.xlu1 %2432 }
 0x6d0   : > { %v2435_v21 = vunpack.i.h.bf16 %v2433_v0  ;;  %v2434_v22 = vunpack.i.l.bf16 %v2433_v0 }
 0x6d2   : > { %v1514_v10 = vpop.permute.xlu0 %1513  ;;  %v1523_v32 = vsel %vm1521_vm7, %v1519_v25, %v2435_v21  ;;  %v1522_v34 = vsel %vm1521_vm7, %v1518_v27, %v2434_v22 }
 0x6d3   : > { %v1528_v16 = vsel %vm1525_vm8, %v1524_v13, %v1514_v10  ;;  %v2180_v10 = vld [vmem:[%s620_s21] ss:$0 sm:$0xff] }
 0x6d4   : > { %v2210_v20 = vpack.c.bf16 %v1528_v16, %v1528_v16 }
 0x6d6   : > { %v1549_v23 = vsel %vm2901_vm10, %v2210_v20, %v1548_v15  ;;  %v2181_v20 = vld [vmem:[%s623_s24] ss:$0 sm:$0xff] }
 0x6d7   : > { %1550 = vst [vmem:[#allocation2 + $0x8] sm:$0x1] %v1549_v23  ;;  %v2438_v24 = vpop.permute.xlu1 %2437 }
 0x6d8   : > { %v2440_v28 = vunpack.i.h.bf16 %v2438_v24  ;;  %v2439_v30 = vunpack.i.l.bf16 %v2438_v24 }
 0x6da   : > { %v1527_v36 = vsel %vm1525_vm8, %v1523_v32, %v2440_v28  ;;  %v1526_v38 = vsel %vm1525_vm8, %v1522_v34, %v2439_v30  ;;  %v2449_v34 = vld [vmem:[%s636_s19] sm:$0xff]  }
 0x6db   : > { %v2209_v7 = vpack.c.bf16 %v1527_v36, %v1527_v36  ;;  %v2208_v29 = vpack.c.bf16 %v1526_v38, %v1526_v38  ;;  %2348 = vmatprep.subr.bf16.mxu0 %v2449_v34  ;;  %v2450_v36 = vld [vmem:[%s636_s19 + $0x8] sm:$0xff]   ;;  %v2451_v38 = vld [vmem:[%s636_s19 + $0x10] sm:$0xff]  }
 0x6dd   : > { %1544 = vst.msk [vmem:[#allocation2 + $0x4] sm:$0xf] %vm1542_vm11, %v2209_v7  ;;  %1543 = vst.msk [vmem:[#allocation2] sm:$0xf] %vm1542_vm11, %v2208_v29  ;;  %v2452_v7 = vld [vmem:[%s636_s19 + $0x18] sm:$0xff]   ;;  %v2453_v29 = vld [vmem:[%s636_s19 + $0x20] sm:$0xff]  }
 0x6de   : > { %v2446_v42 = vld [vmem:[#allocation2 + $0x8] ss:$0 sps:$4 sm:$0x11]  }
 0x6e4   : > { %v2445_v40 = vld [vmem:[#allocation2] sm:$0xff]  }
 0x6e5   : > { %2336 = vmatprep.mubr.msk.bf16.mxu0 %vm654_vm0, %v2445_v40  ;;  %v2454_v40 = vld [vmem:[%s636_s19 + $0x28] sm:$0xff]  }
 0x6e6   : > { %2337 = vmatmul.mubr.msk.bf16.vlgmr.msra.gmra.mrb[12].mxu0 %vm654_vm0, %v2446_v42  ;;  %v2455_v42 = vld [vmem:[%s636_s19 + $0x30] sm:$0xff]  }
 0x6e7   : > { %2349 = vmatpush3.bf16.msra.mxu0 %v2449_v34 }
 0x6e8   : > { %2350 = vmatprep.subr.bf16.mxu0 %v2450_v36 }
 0x6eb   : > { %2351 = vmatpush3.bf16.msra.mxu0 %v2450_v36 }
 0x6ec   : > { %2352 = vmatprep.subr.bf16.mxu0 %v2451_v38 }
 0x6ef   : > { %2353 = vmatpush3.bf16.msra.mxu0 %v2451_v38 }
 0x6f0   : > { %2354 = vmatprep.subr.bf16.mxu0 %v2452_v7 }
 0x6f3   : > { %2355 = vmatpush3.bf16.msra.mxu0 %v2452_v7 }
 0x6f4   : > { %2356 = vmatprep.subr.bf16.mxu0 %v2453_v29 }
 0x6f7   : > { %2357 = vmatpush3.bf16.msra.mxu0 %v2453_v29 }
 0x6f8   : > { %2358 = vmatprep.subr.bf16.mxu0 %v2454_v40 }
 0x6fb   : > { %2359 = vmatpush3.bf16.msra.mxu0 %v2454_v40 }
 0x6fc   : > { %2360 = vmatprep.subr.bf16.mxu0 %v2455_v42 }
 0x6ff   : > { %2361 = vmatpush3.bf16.msra.mxu0 %v2455_v42 }
 0x7b9   : > { %v2338_v26 = vpop.f32.mrb[12].mxu0 }
 0x7ba   : > { %v1625_v43 = vpop.f32.mrb[13].mxu0  ;;  %v1634_v37 = vadd.f32 %v2338_v26, %v2173_v31  ;;  %v2182_v26 = vld [vmem:[%s631_s22] ss:$0 sm:$0xff] }
 0x7bb   : > { %v1626_v33 = vadd.f32 %v2173_v31, %v1625_v43  ;;  %v2339_v35 = vpop.f32.mrb[14].mxu0 }
 0x7bc   : > { %v1628_v39 = vpop.f32.mrb[15].mxu0  ;;  %v2931_v47 = vadd.f32 %v1634_v37, %v2693_v3 }
 0x7bd   : > { %v2923_v45 = vadd.f32 %v2691_v2, %v1626_v33  ;;  %v1629_v44 = vadd.f32 %v2173_v31, %v1628_v39  ;;  %v2456_v31 = vld [vmem:[%s636_s19 + $0x38] sm:$0xff]   ;;  %s644_s19 = scalar_lea.vmem %s3009_s13, %s2372_s15 }
 0x7be   : > { %v1650_v48 = vsel %vm661_vm1, %v2931_v47, 0.0  ;;  %2362 = vmatprep.subr.bf16.mxu0 %v2456_v31 }
 0x7bf   : > { %v2926_v41 = vadd.f32 %v2695_v4, %v1629_v44  ;;  %v1644_v46 = vsel %vm654_vm0, %v2923_v45, 0.0  ;;  %2363 = vmatpush3.bf16.msra.mxu0 %v2456_v31 }
 0x7c0   : > { %1645 = vadd.xlane.f32.xlu1 %v1644_v46 }
 0x7c1   : > { %v1647_v49 = vsel %vm654_vm0, %v2926_v41, 0.0 }
 0x7c2   : > { %1648 = vadd.xlane.f32.xlu0 %v1647_v49 }
 0x7c6   : > { %1651 = vadd.xlane.f32.xlu0 %v1650_v48 }
 0x84d   : > { %v1646_v2 = vpop.xlane.xlu1 %1645 }
 0x84e   : > { %v1653_v51 = vmul.f32 0.03125, %v1646_v2 }
 0x84f   : > { %v1649_v52 = vpop.xlane.xlu0 %1648 }
 0x850   : > { %v1656_v4 = vsub.f32 %v2923_v45, %v1653_v51  ;;  %v1654_v18 = vmul.f32 0.03125, %v1649_v52 }
 0x852   : > { %v1657_v53 = vsub.f32 %v2926_v41, %v1654_v18  ;;  %v1659_v54 = vmul.f32 %v1656_v4, %v1656_v4 }
 0x853   : > { %v1652_v3 = vpop.xlane.xlu0 %1651 }
 0x854   : > { %v1655_v55 = vmul.f32 0.03125, %v1652_v3  ;;  %v1662_v50 = vsel %vm654_vm0, %v1659_v54, 0.0  ;;  %v1660_v56 = vmul.f32 %v1657_v53, %v1657_v53 }
 0x855   : > { %1663 = vadd.xlane.f32.xlu0 %v1662_v50 }
 0x856   : > { %v1658_v57 = vsub.f32 %v2931_v47, %v1655_v55  ;;  %v1665_v60 = vsel %vm654_vm0, %v1660_v56, 0.0 }
 0x857   : > { %1666 = vadd.xlane.f32.xlu1 %v1665_v60 }
 0x858   : > { %v1661_v61 = vmul.f32 %v1658_v57, %v1658_v57 }
 0x85a   : > { %v1668_v62 = vsel %vm661_vm1, %v1661_v61, 0.0 }
 0x85b   : > { %1669 = vadd.xlane.f32.xlu0 %v1668_v62 }
 0x8e2   : > { %v1664_v6 = vpop.xlane.xlu0 %1663 }
 0x8e3   : > { %v1671_v8 = vmul.f32 0.03125, %v1664_v6 }
 0x8e4   : > { %v1667_v9 = vpop.xlane.xlu1 %1666 }
 0x8e5   : > { %v1674_v59 = vadd.f32 1e-05, %v1671_v8  ;;  %v1672_v11 = vmul.f32 0.03125, %v1667_v9  ;;  %v2190_v8 = vld [vmem:[%s639_s16] ss:$0 sm:$0xff] }
 0x8e7   : > { %2511 = vrsqrt.f32 %v1674_v59  ;;  %v1675_v58 = vadd.f32 1e-05, %v1672_v11 }
 0x8e8   : > { %v1670_v12 = vpop.xlane.xlu0 %1669 }
 0x8e9   : > { %2513 = vrsqrt.f32 %v1675_v58  ;;  %v1673_v63 = vmul.f32 0.03125, %v1670_v12 }
 0x8eb   : > { %v1676_v13 = vadd.f32 1e-05, %v1673_v63 }
 0x8ed   : > { %2515 = vrsqrt.f32 %v1676_v13 }
 0x8f1   : > { %v2512_v0 = vpop.eup %2511 }
 0x8f2   : > { %v1680_v15 = vmul.f32 %v2512_v0, %v1656_v4  ;;  %v1943_v0 = vld [vmem:[%s644_s19 + $0x8] sm:$0x1] }
 0x8f3   : > { %v2514_v16 = vpop.eup %2513 }
 0x8f4   : > { %v1681_v17 = vmul.f32 %v2514_v16, %v1657_v53  ;;  %v1689_v19 = vmul.f32 %v2180_v10, %v1680_v15 }
 0x8f6   : > { %v1690_v21 = vmul.f32 %v2180_v10, %v1681_v17  ;;  %v1698_v24 = vadd.f32 %v2181_v20, %v1689_v19 }
 0x8f7   : > { %v2516_v22 = vpop.eup %2515 }
 0x8f8   : > { %v1682_v23 = vmul.f32 %v2516_v22, %v1658_v57  ;;  %v1699_v25 = vadd.f32 %v2181_v20, %v1690_v21 }
 0x8fa   : > { %v1691_v27 = vmul.f32 %v2180_v10, %v1682_v23  ;;  %v1701_v28 = vpack.c.bf16 %v1699_v25, %v1698_v24 }
 0x8fc   : > { %2344 = vmatprep.mubr.msk.bf16.mxu1 %vm654_vm0, %v1701_v28  ;;  %v1700_v30 = vadd.f32 %v2181_v20, %v1691_v27 }
 0x8fe   : > { %v1702_v32 = vpack.c.bf16 %v1700_v30, %v1700_v30 }
 0x900   : > { %2345 = vmatmul.mubr.msk.bf16.vlgmr.msra.gmra.mrb[24].mxu1 %vm654_vm0, %v1702_v32 }
 0x9d3   : > { %v2346_v43 = vpop.f32.mrb[24].mxu1 }
 0x9d4   : > { %v1775_v33 = vadd.f32 %v2346_v43, %v2182_v26  ;;  %v1766_v35 = vpop.f32.mrb[25].mxu1 }
 0x9d5   : > { %v1767_v39 = vadd.f32 %v2182_v26, %v1766_v35  ;;  %v2347_v37 = vpop.f32.mrb[26].mxu1 }
 0x9d6   : > { %v2189_v44 = vmul.f32 -1.702, %v1775_v33  ;;  %v1769_v46 = vpop.f32.mrb[27].mxu1 }
 0x9d7   : > { %v2187_v49 = vmul.f32 -1.702, %v1767_v39  ;;  %v1770_v48 = vadd.f32 %v2182_v26, %v1769_v46 }
 0x9d8   : > { %v1790_v2 = vmul.f32 1.442695, %v2189_v44 }
 0x9d9   : > { %v1786_v51 = vmul.f32 1.442695, %v2187_v49  ;;  %v2188_v52 = vmul.f32 -1.702, %v1770_v48 }
 0x9da   : > { %2517 = vpow2.f32 %v1790_v2 }
 0x9db   : > { %2519 = vpow2.f32 %v1786_v51  ;;  %v1788_v4 = vmul.f32 1.442695, %v2188_v52 }
 0x9dd   : > { %2521 = vpow2.f32 %v1788_v4 }
 0x9e4   : > { %v2518_v18 = vpop.eup %2517 }
 0x9e5   : > { %v2520_v53 = vpop.eup %2519  ;;  %v1794_v54 = vadd.f32 1.0, %v2518_v18 }
 0x9e6   : > { %v1792_v3 = vadd.f32 1.0, %v2520_v53 }
 0x9e7   : > { %v2522_v55 = vpop.eup %2521  ;;  %2523 = vrcp.f32 %v1794_v54 }
 0x9e8   : > { %2525 = vrcp.f32 %v1792_v3  ;;  %v1793_v50 = vadd.f32 1.0, %v2522_v55 }
 0x9ea   : > { %2527 = vrcp.f32 %v1793_v50 }
 0x9f1   : > { %v2524_v56 = vpop.eup %2523 }
 0x9f2   : > { %v2526_v57 = vpop.eup %2525  ;;  %v1803_v61 = vmul.f32 %v2524_v56, %v1775_v33 }
 0x9f3   : > { %v1801_v62 = vmul.f32 %v2526_v57, %v1767_v39 }
 0x9f4   : > { %v2528_v60 = vpop.eup %2527  ;;  %v1805_v6 = vpack.c.bf16 %v1803_v61, %v1803_v61 }
 0x9f5   : > { %v1802_v1 = vmul.f32 %v2528_v60, %v1770_v48 }
 0x9f7   : > { %v1804_v5 = vpack.c.bf16 %v1802_v1, %v1801_v62 }
 0x9f9   : > { %2364 = vmatprep.mubr.bf16.mxu0 %v1804_v5 }
 0x9fa   : > { %2365 = vmatmul.mubr.bf16.vlgmr.msra.gmra.mrb[16].mxu0 %v1805_v6 }
 0xacd   : > { %v2366_v9 = vpop.f32.mrb[16].mxu0 }
 0xace   : > { %v1920_v59 = vadd.f32 %v2366_v9, %v2190_v8  ;;  %v1911_v11 = vpop.f32.mrb[17].mxu0 }
 0xacf   : > { %v1912_v58 = vadd.f32 %v2190_v8, %v1911_v11  ;;  %v2367_v12 = vpop.f32.mrb[18].mxu0 }
 0xad0   : > { %v1927_v63 = vadd.f32 %v1920_v59, %v2931_v47  ;;  %v1914_v13 = vpop.f32.mrb[19].mxu0 }
 0xad1   : > { %v1925_v10 = vadd.f32 %v1912_v58, %v2923_v45  ;;  %v1915_v15 = vadd.f32 %v2190_v8, %v1914_v13 }
 0xad2   : > { %v2213_v16 = vpack.c.bf16 %v1927_v63, %v1927_v63 }
 0xad3   : > { %v2211_v17 = vpack.c.bf16 %v1925_v10, %v1925_v10  ;;  %v1926_v19 = vadd.f32 %v1915_v15, %v2926_v41 }
 0xad4   : > { %v1944_v20 = vsel %vm2901_vm10, %v2213_v16, %v1943_v0 }
 0xad5   : > { %1945 = vst [vmem:[%s644_s19 + $0x8] sm:$0x1] %v1944_v20  ;;  %1941 = vst.msk [vmem:[%s644_s19] sm:$0xf] %vm1542_vm11, %v2211_v17  ;;  %v2212_v21 = vpack.c.bf16 %v1926_v19, %v1926_v19 }
 0xad7   : > { %1942 = vst.msk [vmem:[%s644_s19 + $0x4] sm:$0xf] %vm1542_vm11, %v2212_v21 }
 0xad8 PF: > { %s23_s29 = sadd.s32 1, %s2567_s29   ;;  %s3012_s25 = smov %s2559_s27 }
 0xad9   : > { %p20_p7 = scmp.ge.s32.totalorder %s23_s29, 18   ;;  %s3013_s26 = smov %s2563_s28 }
 0xada   : > { %s3014_s27 = smov %s3017_s30  ;;  %s3015_s28 = smov %s3021_s14 }
 0xadb   :  { %22 = sbr.rel (!%p20_p7) target bundleno = 3 (0x3), region = 138 }

// kernel: clip_visual_encoder_forward.5
= control target key start
LH: loop header
LB: loop body
LE: loop exit
PB: predicated region body
PF: predicated region fallthrough
CT: control target
= control target key end

     0   :  { %vm23_vm0 = vcmask 261120   ;;  %s259_s0 = inlined_call_operand.vmem [shape: bf16[8,32], index: 0, kind: input, shape index: {}]   ;;  %s260_s1 = inlined_call_operand.vmem [shape: f32[1,32], index: 1, kind: input, shape index: {}]   ;;  %s261_s2 = inlined_call_operand.vmem [shape: f32[1,32], index: 2, kind: input, shape index: {}]   ;;  %s262_s3 = inlined_call_operand.vmem [shape: bf16[32,16], index: 3, kind: input, shape index: {}]   ;;  %s263_s4 = inlined_call_operand.hbm [shape: f32[2,16], index: 4, kind: output, shape index: {}]  }
   0x1   :  { %v19_v0 = vld [vmem:[%s259_s0] sm:$0xf] }
   0x2   :  { %v20_v1 = vunpack.c.l.bf16 %v19_v0 }
   0x3   :  { %9 = vsyncpa [#allocation3], 0  ;;  %v173_v8 = vld [vmem:[%s262_s3] sm:$0xff]   ;;  %v201_v9 = vmov 0.0   ;;  %v174_v10 = vld [vmem:[%s262_s3 + $0x8] sm:$0xff]   ;;  %vm202_vm1 = vmmov 0  }
   0x4   :  { %v24_v2 = vsel %vm23_vm0, %v20_v1, 0.0  ;;  %162 = vmatprep.subr.bf16.mxu0 %v201_v9  ;;  %166 = vmatprep.mubr.msk.bf16.mxu0 %vm202_vm1, %v201_v9  ;;  %v154_v15 = vld [vmem:[%s260_s1] ss:$0 sm:$0xff]  ;;  %vm115_vm2 = vcmask 125952   ;;  %s203_s1 = smov [#allocation2]   ;;  %vm135_vm3 = vcmask 1041409  }
   0x5   :  { %25 = vadd.xlane.f32.xlu0 %v24_v2  ;;  %163 = vmatpush3.bf16.msra.mxu0 %v173_v8  ;;  %v155_v17 = vld [vmem:[%s261_s2] ss:$0 sm:$0xff]  ;;  %s146_s2 = sshll.u32 %s203_s1, 4  ;;  %vm138_vm4 = vcmask 123904   ;;  %s147_s2 = int_to_ptr.vmem [resolvable:$true] %s146_s2 }
   0x6   :  { %164 = vmatprep.subr.bf16.mxu0 %v201_v9  ;;  %s177_s3 = scalar_lea.vmem %s147_s2, 32  ;;  %p182_p1 = scmp.lt.s32.totalorder %s147_s2, %s147_s2 }
   0x7   :  { %p178_p0 = scmp.ne.s32.totalorder %s147_s2, %s177_s3  ;;  %p183_p2 = scmp.lt.s32.totalorder %s177_s3, %s177_s3 }
   0x9   :  { %165 = vmatpush3.bf16.msra.mxu0 %v174_v10  ;;  %p184_p3 = por %p183_p2, %p182_p1 }
   0xb   :  { %p185_p4 = pnand %p184_p3, %p178_p0 }
  0x92   :  { %v26_v3 = vpop.xlane.xlu0 %25 }
  0x93   :  { %v28_v4 = vmul.f32 0.03125, %v26_v3 }
  0x95   :  { %v29_v5 = vsub.f32 %v20_v1, %v28_v4 }
  0x97   :  { %v30_v6 = vmul.f32 %v29_v5, %v29_v5 }
  0x99   :  { %v31_v7 = vsel %vm23_vm0, %v30_v6, 0.0 }
  0x9a   :  { %32 = vadd.xlane.f32.xlu0 %v31_v7 }
 0x127   :  { %v33_v11 = vpop.xlane.xlu0 %32 }
 0x128   :  { %v34_v12 = vmul.f32 0.03125, %v33_v11 }
 0x12a   :  { %v35_v13 = vadd.f32 1e-05, %v34_v12 }
 0x12c   :  { %175 = vrsqrt.f32 %v35_v13 }
 0x136   :  { %v176_v14 = vpop.eup %175 }
 0x137   :  { %v37_v16 = vmul.f32 %v176_v14, %v29_v5 }
 0x139   :  { %v44_v18 = vmul.f32 %v154_v15, %v37_v16 }
 0x13b   :  { %v51_v19 = vadd.f32 %v155_v17, %v44_v18 }
 0x13d   :  { %v52_v20 = vpack.c.bf16 %v51_v19, %v51_v19 }
 0x13f   :  { %167 = vmatmul.mubr.msk.bf16.vlgmr.msra.gmra.mrb[0].mxu0 %vm23_vm0, %v52_v20 }
 0x212   :  { %v106_v21 = vpop.f32.mrb[0].mxu0 }
 0x213   :  { %v113_v22 = vcombine.high %v106_v21, %v106_v21  ;;  %v116_v23 = vsel %vm115_vm2, %v106_v21, 0.0  ;;  %v168_v24 = vpop.f32.mrb[1].mxu0 }
 0x214   :  { %v117_v25 = vrot.slane %v116_v23, 4  ;;  %v109_v26 = vpop.f32.mrb[2].mxu0 }
 0x215   :  { %v123_v27 = vsel %vm115_vm2, %v113_v22, 0.0  ;;  %v169_v28 = vpop.f32.mrb[3].mxu0 }
 0x216   :  { %v118_v29 = vadd.f32 %v117_v25, %v116_v23  ;;  %v124_v30 = vrot.slane %v123_v27, 4 }
 0x218   :  { %v119_v31 = vrot.slane %v118_v29, 2  ;;  %v125_v32 = vadd.f32 %v124_v30, %v123_v27 }
 0x21a   :  { %v120_v33 = vadd.f32 %v119_v31, %v118_v29  ;;  %v126_v34 = vrot.slane %v125_v32, 2 }
 0x21c   :  { %v121_v35 = vrot.slane %v120_v33, 1  ;;  %v127_v36 = vadd.f32 %v126_v34, %v125_v32 }
 0x21e   :  { %v122_v37 = vadd.f32 %v121_v35, %v120_v33  ;;  %v128_v38 = vrot.slane %v127_v36, 1 }
 0x220   :  { %v129_v39 = vadd.f32 %v128_v38, %v127_v36  ;;  %v131_v40 = vmul.f32 0.25, %v122_v37 }
 0x222   :  { %v132_v41 = vmul.f32 0.25, %v129_v39 }
 0x224   :  { %v136_v42 = vsel %vm135_vm3, %v132_v41, %v131_v40 }
 0x225   :  { %139 = vst.msk [vmem:[#allocation2] sm:$0x3] %vm138_vm4, %v136_v42 }
 0x226   :  { %188 = shalt.err (!%p185_p4)
}
 0x227   :  { %s189_s26 = scalar_lea.hbm %s263_s4, 32 }
 0x228   :  { %p190_p5 = scmp.ne.s32.totalorder %s263_s4, %s189_s26  ;;  %p193_p6 = scmp.lt.u32.totalorder %s189_s26, %s263_s4 }
 0x22a   :  { %p195_p7 = pnand %p193_p6, %p190_p5 }
 0x22c   :  { %198 = shalt.err (!%p195_p7)
}
 0x22d   :  { %149 = dma.vmem_to_hbm [thread:$0]  %s147_s2, 32, %s263_s4, [#allocation3]  }
 0x22e   :  { %199 = dma.done.wait [#allocation3], 32  }
 0x22f   :  { %200 = vsyncadd [#allocation3], 4294967264 }
 0x230   :  { %153 = vsyncpa [#allocation3], 1 }

</bundles_post_ra>
